<compile_context>
chip_gen: v7x
topology: tpu7x:2x2x1
jax: 0.10.0
libtpu: 0.0.40
codegen_flags: <defaults>
</compile_context>

<pallas_src>
import jax
import jax.numpy as jnp
from jax import lax
from jax.experimental import pallas as pl
from jax.experimental.pallas import tpu as pltpu

NEG_SLOPE = 0.2          # GATv2Conv default negative_slope
EDGE_DIM = 3

# Static per-layer configuration of GATNet (matches the PyTorch module).
LAYER_CFGS = (
    dict(in_ch=2,       out_ch=16, heads=8, concat=True,  elu=True),
    dict(in_ch=16 * 8,  out_ch=64, heads=8, concat=True,  elu=True),
    dict(in_ch=64 * 8,  out_ch=32, heads=4, concat=True,  elu=True),
    dict(in_ch=32 * 4,  out_ch=4,  heads=1, concat=False, elu=False),
)

_VMEM = pl.BlockSpec(memory_space=pltpu.MemorySpace.VMEM)


# --------------------------------------------------------------------------
# Fused Pallas kernel: all four GATv2 layers in one program
# --------------------------------------------------------------------------
def _gatnet_kernel(x_ref, s_ref, t_ref, ea_ref, *rest):
    n_layers = len(LAYER_CFGS)
    layer_refs = [rest[6 * l: 6 * (l + 1)] for l in range(n_layers)]
    out_ref = rest[6 * n_layers]
    alpha_ref = rest[6 * n_layers + 1]

    S = s_ref[...]                                   # (E, N) bf16 one-hot(src)
    T = t_ref[...]                                   # (E, N) bf16 one-hot(dst)
    ea16 = ea_ref[...].astype(jnp.bfloat16)          # (E, EDGE_DIM)

    h = x_ref[...]                                   # (N, Fin) f32
    for l, cfg in enumerate(LAYER_CFGS):
        w_ref, blr_ref, we_ref, attg_ref, exp_ref, bias_ref = layer_refs[l]
        H, C = cfg['heads'], cfg['out_ch']
        HC = H * C
        last = l == n_layers - 1

        # ---- fused lin_l | lin_r node projection (bf16 MXU, f32 accum) ----
        xlr = jnp.dot(h.astype(jnp.bfloat16), w_ref[...],
                      preferred_element_type=jnp.float32) + blr_ref[...]
        xl = xlr[:, :HC]                             # (N, HC)
        xr = xlr[:, HC:]                             # (N, HC)
        ee = jnp.dot(ea16, we_ref[...],
                     preferred_element_type=jnp.float32)          # (E, HC)

        # ---- gather projected features to edges (one-hot bf16 MXU) ----
        xl_e = jnp.dot(S, xl.astype(jnp.bfloat16),
                       preferred_element_type=jnp.float32)        # (E, HC)
        xr_e = jnp.dot(T, xr.astype(jnp.bfloat16),
                       preferred_element_type=jnp.float32)        # (E, HC)

        m = xl_e + xr_e + ee
        m = jnp.where(m > 0, m, NEG_SLOPE * m)       # LeakyReLU (VPU)

        # ---- attention logits: one (E,HC)x(HC,H) matmul, att folded in ----
        logits = jnp.dot(m.astype(jnp.bfloat16), attg_ref[...],
                         preferred_element_type=jnp.float32)      # (E, H)
        # Softmax is shift-invariant per segment -> per-head global max shift
        # replaces the per-segment masked-max loop.  (If logit spreads ever
        # become huge, restore per-segment maxima to avoid exp underflow.)
        logits = logits - jnp.max(logits, axis=0, keepdims=True)
        p = jnp.exp(logits)                                        # (E, H)
        p16 = p.astype(jnp.bfloat16)

        # ---- segment-softmax denominator per target node (scatter-add) ----
        denom_node = lax.dot_general(
            T, p16, (((0,), (0,)), ((), ())),
            preferred_element_type=jnp.float32) + 1e-16            # (N, H)

        # ---- un-normalised aggregation, then node-level normalisation ----
        if H == 1:
            weighted = xl_e * p                                    # lane bcast
        else:
            p_full = jnp.dot(p16, exp_ref[...],
                             preferred_element_type=jnp.float32)   # (E, HC)
            weighted = xl_e * p_full
        agg = lax.dot_general(
            T, weighted.astype(jnp.bfloat16), (((0,), (0,)), ((), ())),
            preferred_element_type=jnp.float32)                    # (N, HC)
        if H == 1:
            out = agg / denom_node
        else:
            denom_full = jnp.dot(denom_node.astype(jnp.bfloat16), exp_ref[...],
                                 preferred_element_type=jnp.float32)
            out = agg / denom_full

        # ---- epilogue: head-mean / bias / ELU fused ----
        if (not cfg['concat']) and H > 1:
            acc = out[:, 0:C]
            for hh in range(1, H):
                acc = acc + out[:, hh * C:(hh + 1) * C]
            out = acc * (1.0 / H)
        out = out + bias_ref[...]
        if cfg['elu']:
            out = jnp.where(out > 0, out, jnp.exp(jnp.minimum(out, 0.0)) - 1.0)

        if last:
            out_ref[...] = out
            # Explicit attention weights only for the final layer: gather the
            # per-node inverse denominator back to edges and scale exp(logit).
            inv_e = jnp.dot(T, (1.0 / denom_node).astype(jnp.bfloat16),
                            preferred_element_type=jnp.float32)    # (E, H=1)
            alpha_ref[...] = p * inv_e
        else:
            h = out


# --------------------------------------------------------------------------
# VMEM budget + advisory cost estimate
# --------------------------------------------------------------------------
def _vmem_capacity_bytes():
    try:
        return int(pltpu.get_tpu_info().vmem_capacity_bytes)
    except Exception:
        return 64 * 1024 * 1024      # conservative fallback (v7x-sized)


def _budget(N, E, in_dim):
    flops = 0
    trans = 0
    peak_scratch = 0
    weight_bytes = 0
    for cfg in LAYER_CFGS:
        H, C, fin = cfg['heads'], cfg['out_ch'], cfg['in_ch']
        HC = H * C
        flops += (4 * N * fin * HC            # fused lin_l|lin_r projection
                  + 2 * E * EDGE_DIM * HC     # edge projection
                  + 6 * E * N * HC            # two gathers + one scatter
                  + 2 * E * N * H             # denominator scatter
                  + 4 * E * HC * H            # logits + head broadcast
                  + 2 * N * H * HC            # denominator broadcast
                  + 12 * E * HC)              # elementwise
        trans += E * H + (N * HC if cfg['elu'] else 0)
        weight_bytes += ((fin * 2 * HC + EDGE_DIM * HC + 2 * HC * H) * 2
                         + (2 * HC + HC) * 4)
        # largest simultaneously-live per-layer intermediates (no grid ->
        # nothing is double buffered)
        scratch = (4 * N * (3 * HC + fin)
                   + E * HC * (4 * 6 + 2 * 3)
                   + 20 * E * H + 12 * N * HC)
        peak_scratch = max(peak_scratch, scratch)
    io_bytes = (N * in_dim * 4 + 2 * E * N * 2 + E * EDGE_DIM * 4 + weight_bytes
                + N * LAYER_CFGS[-1]['out_ch'] * 4
                + E * LAYER_CFGS[-1]['heads'] * 4)
    cap = _vmem_capacity_bytes()
    vmem_limit = int(min(max(int(1.25 * (io_bytes + peak_scratch)),
                             16 * 1024 * 1024),
                         int(0.75 * cap)))
    cost = pl.CostEstimate(flops=int(flops), transcendentals=int(trans),
                           bytes_accessed=int(io_bytes))
    return vmem_limit, cost


# --------------------------------------------------------------------------
# Wrapper: single fused pallas_call for the whole network
# --------------------------------------------------------------------------
def gatnet_forward(x, S, T, ea, params):
    N, E = x.shape[0], S.shape[0]
    flat = [x, S, T, ea]
    for p in params:
        flat += [p['W'].astype(jnp.bfloat16), p['blr'],
                 p['we'].astype(jnp.bfloat16), p['attg'].astype(jnp.bfloat16),
                 p['expand'].astype(jnp.bfloat16), p['bias']]

    last = LAYER_CFGS[-1]
    out_dim = last['heads'] * last['out_ch'] if last['concat'] else last['out_ch']
    vmem_limit, cost = _budget(N, E, x.shape[1])

    out, alpha = pl.pallas_call(
        _gatnet_kernel,
        out_shape=(jax.ShapeDtypeStruct((N, out_dim), jnp.float32),
                   jax.ShapeDtypeStruct((E, last['heads']), jnp.float32)),
        in_specs=[_VMEM] * len(flat),
        out_specs=(_VMEM, _VMEM),
        compiler_params=pltpu.CompilerParams(vmem_limit_bytes=vmem_limit),
        cost_estimate=cost,
    )(*flat)
    return out, alpha


# --------------------------------------------------------------------------
# Parameters (deterministic glorot init; zero biases like PyG defaults)
# --------------------------------------------------------------------------
def _glorot(key, shape):
    fan_in, fan_out = shape
    limit = jnp.sqrt(6.0 / (fan_in + fan_out))
    return jax.random.uniform(key, shape, jnp.float32, -limit, limit)


def init_gatv2_params(key, in_ch, out_ch, heads, edge_dim, concat):
    ks = jax.random.split(key, 4)
    HC = heads * out_ch
    wl = _glorot(ks[0], (in_ch, HC))
    wr = _glorot(ks[1], (in_ch, HC))
    we = _glorot(ks[2], (edge_dim, HC))          # lin_edge (no bias)
    att = _glorot(ks[3], (1, HC))                # flattened (1, H, C)

    W = jnp.concatenate([wl, wr], axis=1)        # fused lin_l | lin_r
    blr = jnp.zeros((1, 2 * HC), jnp.float32)
    bias = jnp.zeros((1, HC if concat else out_ch), jnp.float32)

    head_of = jnp.arange(HC) // out_ch
    heads_r = jnp.arange(heads)
    # att folded into a block-diagonal (HC, H) grouping matrix: logits = m @ attg
    attg = jnp.where(head_of[:, None] == heads_r[None, :], att[0][:, None], 0.0)
    # 0/1 (H, HC) block matrix broadcasting per-head scalars across C lanes
    expand = (head_of[None, :] == heads_r[:, None]).astype(jnp.float32)
    return dict(W=W, blr=blr, we=we, attg=attg, expand=expand, bias=bias)


# --------------------------------------------------------------------------
# Graph preprocessing glue (GATv2Conv add_self_loops, fill_value='mean')
# --------------------------------------------------------------------------
def add_self_loops(edge_index, edge_attr, num_nodes):
    dst = edge_index[1]
    sums = jnp.zeros((num_nodes, edge_attr.shape[1]),
                     edge_attr.dtype).at[dst].add(edge_attr)
    cnts = jnp.zeros((num_nodes,), jnp.float32).at[dst].add(1.0)
    loop_attr = sums / jnp.maximum(cnts, 1.0)[:, None]
    loop_idx = jnp.arange(num_nodes, dtype=edge_index.dtype)
    new_ei = jnp.concatenate([edge_index,
                              jnp.stack([loop_idx, loop_idx])], axis=1)
    new_ea = jnp.concatenate([edge_attr, loop_attr], axis=0)
    return new_ei, new_ea


# --------------------------------------------------------------------------
# GATNet
# --------------------------------------------------------------------------
class GATNetPallas:
    def __init__(self, key):
        ks = jax.random.split(key, len(LAYER_CFGS))
        self.params = [
            init_gatv2_params(ks[i], cfg['in_ch'], cfg['out_ch'], cfg['heads'],
                              EDGE_DIM, cfg['concat'])
            for i, cfg in enumerate(LAYER_CFGS)
        ]

    def __call__(self, x, edge_index, edge_attr):
        N = x.shape[0]
        ei, ea = add_self_loops(edge_index, edge_attr, N)
        src, dst = ei[0], ei[1]
        node_ids = jnp.arange(N)
        # one-hot gather/scatter operands in bf16 (exactly 0/1 -> lossless)
        S = (src[:, None] == node_ids[None, :]).astype(jnp.bfloat16)  # (E', N)
        T = (dst[:, None] == node_ids[None, :]).astype(jnp.bfloat16)  # (E', N)
        out, alpha = gatnet_forward(x, S, T, ea, self.params)
        return out, (ei, alpha)


# --------------------------------------------------------------------------
if __name__ == "__main__":
    key = jax.random.PRNGKey(0)
    kx, ke, kp = jax.random.split(key, 3)

    N, E = 8, 16
    x = jax.random.normal(kx, (N, 2), jnp.float32)
    # deterministic directed ring in both directions (no self loops)
    src = jnp.array([0, 1, 2, 3, 4, 5, 6, 7, 1, 2, 3, 4, 5, 6, 7, 0], jnp.int32)
    dst = jnp.array([1, 2, 3, 4, 5, 6, 7, 0, 0, 1, 2, 3, 4, 5, 6, 7], jnp.int32)
    edge_index = jnp.stack([src, dst])
    edge_attr = jax.random.normal(ke, (E, 3), jnp.float32)

    model = GATNetPallas(kp)
    fwd = jax.jit(lambda a, b, c: model(a, b, c))
    out, (ei_out, alpha) = fwd(x, edge_index, edge_attr)
    jax.block_until_ready((out, ei_out, alpha))

    assert out.shape == (N, 4)
    assert ei_out.shape == (2, E + N)        # self-loops appended inside conv
    assert alpha.shape == (E + N, 1)         # attention weights of last layer
    assert bool(jnp.all(jnp.isfinite(out)))
    # attention coefficients must (approximately) sum to 1 per target node
    seg_sum = jnp.zeros((N,), jnp.float32).at[ei_out[1]].add(alpha[:, 0])
    assert bool(jnp.max(jnp.abs(seg_sum - 1.0)) < 1e-2)
    print("KERNEL_OK")
</pallas_src>

<mosaic_0001>
module attributes {stable_mosaic.version = 11 : i64} {
  func.func private @main(%arg0: i32) attributes {dimension_semantics = [#tpu.dimension_semantics<core_parallel>], iteration_bounds = array<i64: 2>, tpu.core_type = #tpu.core_type<sc_scalar_subcore>, window_params = []} {
    return
  }
}

module attributes {stable_mosaic.version = 11 : i64} {
  func.func private @main(%arg0: i32) attributes {dimension_semantics = [#tpu.dimension_semantics<core_parallel>], iteration_bounds = array<i64: 2>, tpu.core_type = #tpu.core_type<sc_scalar_subcore>, window_params = []} {
    return
  }
}

module attributes {stable_mosaic.version = 11 : i64} {
  func.func @_gatnet_kernel(%arg0: memref<8x2xf32, #tpu.memory_space<vmem>>, %arg1: memref<24x8xbf16, #tpu.memory_space<vmem>>, %arg2: memref<24x8xbf16, #tpu.memory_space<vmem>>, %arg3: memref<24x3xf32, #tpu.memory_space<vmem>>, %arg4: memref<2x256xbf16, #tpu.memory_space<vmem>>, %arg5: memref<1x256xf32, #tpu.memory_space<vmem>>, %arg6: memref<3x128xbf16, #tpu.memory_space<vmem>>, %arg7: memref<128x8xbf16, #tpu.memory_space<vmem>>, %arg8: memref<8x128xbf16, #tpu.memory_space<vmem>>, %arg9: memref<1x128xf32, #tpu.memory_space<vmem>>, %arg10: memref<128x1024xbf16, #tpu.memory_space<vmem>>, %arg11: memref<1x1024xf32, #tpu.memory_space<vmem>>, %arg12: memref<3x512xbf16, #tpu.memory_space<vmem>>, %arg13: memref<512x8xbf16, #tpu.memory_space<vmem>>, %arg14: memref<8x512xbf16, #tpu.memory_space<vmem>>, %arg15: memref<1x512xf32, #tpu.memory_space<vmem>>, %arg16: memref<512x256xbf16, #tpu.memory_space<vmem>>, %arg17: memref<1x256xf32, #tpu.memory_space<vmem>>, %arg18: memref<3x128xbf16, #tpu.memory_space<vmem>>, %arg19: memref<128x4xbf16, #tpu.memory_space<vmem>>, %arg20: memref<4x128xbf16, #tpu.memory_space<vmem>>, %arg21: memref<1x128xf32, #tpu.memory_space<vmem>>, %arg22: memref<128x8xbf16, #tpu.memory_space<vmem>>, %arg23: memref<1x8xf32, #tpu.memory_space<vmem>>, %arg24: memref<3x4xbf16, #tpu.memory_space<vmem>>, %arg25: memref<4x1xbf16, #tpu.memory_space<vmem>>, %arg26: memref<1x4xbf16, #tpu.memory_space<vmem>>, %arg27: memref<1x4xf32, #tpu.memory_space<vmem>>, %arg28: memref<8x4xf32, #tpu.memory_space<vmem>>, %arg29: memref<24x1xf32, #tpu.memory_space<vmem>>) attributes {dimension_semantics = [], scalar_prefetch = 0 : i64, scratch_operands = 0 : i64, tpu.core_type = #tpu.core_type<tc>} {
    %c0 = arith.constant 0 : index
    %c0_0 = arith.constant 0 : index
    %0 = vector.load %arg1[%c0, %c0_0] : memref<24x8xbf16, #tpu.memory_space<vmem>>, vector<24x8xbf16>
    %c0_1 = arith.constant 0 : index
    %c0_2 = arith.constant 0 : index
    %1 = vector.load %arg2[%c0_1, %c0_2] : memref<24x8xbf16, #tpu.memory_space<vmem>>, vector<24x8xbf16>
    %c0_3 = arith.constant 0 : index
    %c0_4 = arith.constant 0 : index
    %2 = vector.load %arg3[%c0_3, %c0_4] : memref<24x3xf32, #tpu.memory_space<vmem>>, vector<24x3xf32>
    %3 = arith.truncf %2 : vector<24x3xf32> to vector<24x3xbf16>
    %c0_5 = arith.constant 0 : index
    %c0_6 = arith.constant 0 : index
    %4 = vector.load %arg0[%c0_5, %c0_6] : memref<8x2xf32, #tpu.memory_space<vmem>>, vector<8x2xf32>
    %5 = arith.truncf %4 : vector<8x2xf32> to vector<8x2xbf16>
    %c0_7 = arith.constant 0 : index
    %c0_8 = arith.constant 0 : index
    %6 = vector.load %arg4[%c0_7, %c0_8] : memref<2x256xbf16, #tpu.memory_space<vmem>>, vector<2x256xbf16>
    %cst = arith.constant dense<0.000000e+00> : vector<8x256xf32>
    %7 = tpu.matmul %5, %6, %cst {dimension_numbers = #tpu.dot_dimension_numbers<[1], [0], [0], [1], [0, 0, 1, 1], [], []>} : vector<8x2xbf16>, vector<2x256xbf16>, vector<8x256xf32> -> vector<8x256xf32>
    %c0_9 = arith.constant 0 : index
    %c0_10 = arith.constant 0 : index
    %8 = vector.load %arg5[%c0_9, %c0_10] : memref<1x256xf32, #tpu.memory_space<vmem>>, vector<1x256xf32>
    %9 = vector.broadcast %8 : vector<1x256xf32> to vector<8x256xf32>
    %10 = arith.addf %7, %9 : vector<8x256xf32>
    %11 = vector.extract_strided_slice %10 {offsets = [0, 0], sizes = [8, 128], strides = [1, 1]} : vector<8x256xf32> to vector<8x128xf32>
    %12 = vector.extract_strided_slice %10 {offsets = [0, 128], sizes = [8, 128], strides = [1, 1]} : vector<8x256xf32> to vector<8x128xf32>
    %c0_11 = arith.constant 0 : index
    %c0_12 = arith.constant 0 : index
    %13 = vector.load %arg6[%c0_11, %c0_12] : memref<3x128xbf16, #tpu.memory_space<vmem>>, vector<3x128xbf16>
    %cst_13 = arith.constant dense<0.000000e+00> : vector<24x128xf32>
    %14 = tpu.matmul %3, %13, %cst_13 {dimension_numbers = #tpu.dot_dimension_numbers<[1], [0], [0], [1], [0, 0, 1, 1], [], []>} : vector<24x3xbf16>, vector<3x128xbf16>, vector<24x128xf32> -> vector<24x128xf32>
    %15 = arith.truncf %11 : vector<8x128xf32> to vector<8x128xbf16>
    %cst_14 = arith.constant dense<0.000000e+00> : vector<24x128xf32>
    %16 = tpu.matmul %0, %15, %cst_14 {dimension_numbers = #tpu.dot_dimension_numbers<[1], [0], [0], [1], [0, 0, 1, 1], [], []>} : vector<24x8xbf16>, vector<8x128xbf16>, vector<24x128xf32> -> vector<24x128xf32>
    %17 = arith.truncf %12 : vector<8x128xf32> to vector<8x128xbf16>
    %cst_15 = arith.constant dense<0.000000e+00> : vector<24x128xf32>
    %18 = tpu.matmul %1, %17, %cst_15 {dimension_numbers = #tpu.dot_dimension_numbers<[1], [0], [0], [1], [0, 0, 1, 1], [], []>} : vector<24x8xbf16>, vector<8x128xbf16>, vector<24x128xf32> -> vector<24x128xf32>
    %19 = arith.addf %16, %18 : vector<24x128xf32>
    %20 = arith.addf %19, %14 : vector<24x128xf32>
    %cst_16 = arith.constant 0.000000e+00 : f32
    %21 = vector.broadcast %cst_16 : f32 to vector<24x128xf32>
    %22 = arith.cmpf ogt, %20, %21 : vector<24x128xf32>
    %cst_17 = arith.constant 2.000000e-01 : f32
    %23 = vector.broadcast %cst_17 : f32 to vector<24x128xf32>
    %24 = arith.mulf %23, %20 : vector<24x128xf32>
    %25 = arith.select %22, %20, %24 : vector<24x128xi1>, vector<24x128xf32>
    %26 = arith.truncf %25 : vector<24x128xf32> to vector<24x128xbf16>
    %c0_18 = arith.constant 0 : index
    %c0_19 = arith.constant 0 : index
    %27 = vector.load %arg7[%c0_18, %c0_19] : memref<128x8xbf16, #tpu.memory_space<vmem>>, vector<128x8xbf16>
    %cst_20 = arith.constant dense<0.000000e+00> : vector<24x8xf32>
    %28 = tpu.matmul %26, %27, %cst_20 {dimension_numbers = #tpu.dot_dimension_numbers<[1], [0], [0], [1], [0, 0, 1, 1], [], []>} : vector<24x128xbf16>, vector<128x8xbf16>, vector<24x8xf32> -> vector<24x8xf32>
    %cst_21 = arith.constant dense<0xFF800000> : vector<8xf32>
    %29 = vector.multi_reduction <maximumf>, %28, %cst_21 [0] : vector<24x8xf32> to vector<8xf32>
    %30 = vector.shape_cast %29 : vector<8xf32> to vector<1x8xf32>
    %31 = vector.broadcast %30 : vector<1x8xf32> to vector<24x8xf32>
    %32 = arith.subf %28, %31 : vector<24x8xf32>
    %33 = math.exp %32 : vector<24x8xf32>
    %34 = arith.truncf %33 : vector<24x8xf32> to vector<24x8xbf16>
    %cst_22 = arith.constant dense<0.000000e+00> : vector<8x8xf32>
    %35 = tpu.matmul %1, %34, %cst_22 {dimension_numbers = #tpu.dot_dimension_numbers<[0], [0], [1], [1], [0, 1, 1, 1], [], []>} : vector<24x8xbf16>, vector<24x8xbf16>, vector<8x8xf32> -> vector<8x8xf32>
    %cst_23 = arith.constant 1.000000e-16 : f32
    %36 = vector.broadcast %cst_23 : f32 to vector<8x8xf32>
    %37 = arith.addf %35, %36 : vector<8x8xf32>
    %c0_24 = arith.constant 0 : index
    %c0_25 = arith.constant 0 : index
    %38 = vector.load %arg8[%c0_24, %c0_25] : memref<8x128xbf16, #tpu.memory_space<vmem>>, vector<8x128xbf16>
    %cst_26 = arith.constant dense<0.000000e+00> : vector<24x128xf32>
    %39 = tpu.matmul %34, %38, %cst_26 {dimension_numbers = #tpu.dot_dimension_numbers<[1], [0], [0], [1], [0, 0, 1, 1], [], []>} : vector<24x8xbf16>, vector<8x128xbf16>, vector<24x128xf32> -> vector<24x128xf32>
    %40 = arith.mulf %16, %39 : vector<24x128xf32>
    %41 = arith.truncf %40 : vector<24x128xf32> to vector<24x128xbf16>
    %cst_27 = arith.constant dense<0.000000e+00> : vector<8x128xf32>
    %42 = tpu.matmul %1, %41, %cst_27 {dimension_numbers = #tpu.dot_dimension_numbers<[0], [0], [1], [1], [0, 1, 1, 1], [], []>} : vector<24x8xbf16>, vector<24x128xbf16>, vector<8x128xf32> -> vector<8x128xf32>
    %43 = arith.truncf %37 : vector<8x8xf32> to vector<8x8xbf16>
    %c0_28 = arith.constant 0 : index
    %c0_29 = arith.constant 0 : index
    %44 = vector.load %arg8[%c0_28, %c0_29] : memref<8x128xbf16, #tpu.memory_space<vmem>>, vector<8x128xbf16>
    %cst_30 = arith.constant dense<0.000000e+00> : vector<8x128xf32>
    %45 = tpu.matmul %43, %44, %cst_30 {dimension_numbers = #tpu.dot_dimension_numbers<[1], [0], [0], [1], [0, 0, 1, 1], [], []>} : vector<8x8xbf16>, vector<8x128xbf16>, vector<8x128xf32> -> vector<8x128xf32>
    %46 = arith.divf %42, %45 : vector<8x128xf32>
    %c0_31 = arith.constant 0 : index
    %c0_32 = arith.constant 0 : index
    %47 = vector.load %arg9[%c0_31, %c0_32] : memref<1x128xf32, #tpu.memory_space<vmem>>, vector<1x128xf32>
    %48 = vector.broadcast %47 : vector<1x128xf32> to vector<8x128xf32>
    %49 = arith.addf %46, %48 : vector<8x128xf32>
    %cst_33 = arith.constant 0.000000e+00 : f32
    %50 = vector.broadcast %cst_33 : f32 to vector<8x128xf32>
    %51 = arith.cmpf ogt, %49, %50 : vector<8x128xf32>
    %cst_34 = arith.constant 0.000000e+00 : f32
    %52 = vector.broadcast %cst_34 : f32 to vector<8x128xf32>
    %53 = arith.minimumf %49, %52 : vector<8x128xf32>
    %54 = math.exp %53 : vector<8x128xf32>
    %cst_35 = arith.constant 1.000000e+00 : f32
    %55 = vector.broadcast %cst_35 : f32 to vector<8x128xf32>
    %56 = arith.subf %54, %55 : vector<8x128xf32>
    %57 = arith.select %51, %49, %56 : vector<8x128xi1>, vector<8x128xf32>
    %58 = arith.truncf %57 : vector<8x128xf32> to vector<8x128xbf16>
    %c0_36 = arith.constant 0 : index
    %c0_37 = arith.constant 0 : index
    %59 = vector.load %arg10[%c0_36, %c0_37] : memref<128x1024xbf16, #tpu.memory_space<vmem>>, vector<128x1024xbf16>
    %cst_38 = arith.constant dense<0.000000e+00> : vector<8x1024xf32>
    %60 = tpu.matmul %58, %59, %cst_38 {dimension_numbers = #tpu.dot_dimension_numbers<[1], [0], [0], [1], [0, 0, 1, 1], [], []>} : vector<8x128xbf16>, vector<128x1024xbf16>, vector<8x1024xf32> -> vector<8x1024xf32>
    %c0_39 = arith.constant 0 : index
    %c0_40 = arith.constant 0 : index
    %61 = vector.load %arg11[%c0_39, %c0_40] : memref<1x1024xf32, #tpu.memory_space<vmem>>, vector<1x1024xf32>
    %62 = vector.broadcast %61 : vector<1x1024xf32> to vector<8x1024xf32>
    %63 = arith.addf %60, %62 : vector<8x1024xf32>
    %64 = vector.extract_strided_slice %63 {offsets = [0, 0], sizes = [8, 512], strides = [1, 1]} : vector<8x1024xf32> to vector<8x512xf32>
    %65 = vector.extract_strided_slice %63 {offsets = [0, 512], sizes = [8, 512], strides = [1, 1]} : vector<8x1024xf32> to vector<8x512xf32>
    %c0_41 = arith.constant 0 : index
    %c0_42 = arith.constant 0 : index
    %66 = vector.load %arg12[%c0_41, %c0_42] : memref<3x512xbf16, #tpu.memory_space<vmem>>, vector<3x512xbf16>
    %cst_43 = arith.constant dense<0.000000e+00> : vector<24x512xf32>
    %67 = tpu.matmul %3, %66, %cst_43 {dimension_numbers = #tpu.dot_dimension_numbers<[1], [0], [0], [1], [0, 0, 1, 1], [], []>} : vector<24x3xbf16>, vector<3x512xbf16>, vector<24x512xf32> -> vector<24x512xf32>
    %68 = arith.truncf %64 : vector<8x512xf32> to vector<8x512xbf16>
    %cst_44 = arith.constant dense<0.000000e+00> : vector<24x512xf32>
    %69 = tpu.matmul %0, %68, %cst_44 {dimension_numbers = #tpu.dot_dimension_numbers<[1], [0], [0], [1], [0, 0, 1, 1], [], []>} : vector<24x8xbf16>, vector<8x512xbf16>, vector<24x512xf32> -> vector<24x512xf32>
    %70 = arith.truncf %65 : vector<8x512xf32> to vector<8x512xbf16>
    %cst_45 = arith.constant dense<0.000000e+00> : vector<24x512xf32>
    %71 = tpu.matmul %1, %70, %cst_45 {dimension_numbers = #tpu.dot_dimension_numbers<[1], [0], [0], [1], [0, 0, 1, 1], [], []>} : vector<24x8xbf16>, vector<8x512xbf16>, vector<24x512xf32> -> vector<24x512xf32>
    %72 = arith.addf %69, %71 : vector<24x512xf32>
    %73 = arith.addf %72, %67 : vector<24x512xf32>
    %cst_46 = arith.constant 0.000000e+00 : f32
    %74 = vector.broadcast %cst_46 : f32 to vector<24x512xf32>
    %75 = arith.cmpf ogt, %73, %74 : vector<24x512xf32>
    %cst_47 = arith.constant 2.000000e-01 : f32
    %76 = vector.broadcast %cst_47 : f32 to vector<24x512xf32>
    %77 = arith.mulf %76, %73 : vector<24x512xf32>
    %78 = arith.select %75, %73, %77 : vector<24x512xi1>, vector<24x512xf32>
    %79 = arith.truncf %78 : vector<24x512xf32> to vector<24x512xbf16>
    %c0_48 = arith.constant 0 : index
    %c0_49 = arith.constant 0 : index
    %80 = vector.load %arg13[%c0_48, %c0_49] : memref<512x8xbf16, #tpu.memory_space<vmem>>, vector<512x8xbf16>
    %cst_50 = arith.constant dense<0.000000e+00> : vector<24x8xf32>
    %81 = tpu.matmul %79, %80, %cst_50 {dimension_numbers = #tpu.dot_dimension_numbers<[1], [0], [0], [1], [0, 0, 1, 1], [], []>} : vector<24x512xbf16>, vector<512x8xbf16>, vector<24x8xf32> -> vector<24x8xf32>
    %cst_51 = arith.constant dense<0xFF800000> : vector<8xf32>
    %82 = vector.multi_reduction <maximumf>, %81, %cst_51 [0] : vector<24x8xf32> to vector<8xf32>
    %83 = vector.shape_cast %82 : vector<8xf32> to vector<1x8xf32>
    %84 = vector.broadcast %83 : vector<1x8xf32> to vector<24x8xf32>
    %85 = arith.subf %81, %84 : vector<24x8xf32>
    %86 = math.exp %85 : vector<24x8xf32>
    %87 = arith.truncf %86 : vector<24x8xf32> to vector<24x8xbf16>
    %cst_52 = arith.constant dense<0.000000e+00> : vector<8x8xf32>
    %88 = tpu.matmul %1, %87, %cst_52 {dimension_numbers = #tpu.dot_dimension_numbers<[0], [0], [1], [1], [0, 1, 1, 1], [], []>} : vector<24x8xbf16>, vector<24x8xbf16>, vector<8x8xf32> -> vector<8x8xf32>
    %cst_53 = arith.constant 1.000000e-16 : f32
    %89 = vector.broadcast %cst_53 : f32 to vector<8x8xf32>
    %90 = arith.addf %88, %89 : vector<8x8xf32>
    %c0_54 = arith.constant 0 : index
    %c0_55 = arith.constant 0 : index
    %91 = vector.load %arg14[%c0_54, %c0_55] : memref<8x512xbf16, #tpu.memory_space<vmem>>, vector<8x512xbf16>
    %cst_56 = arith.constant dense<0.000000e+00> : vector<24x512xf32>
    %92 = tpu.matmul %87, %91, %cst_56 {dimension_numbers = #tpu.dot_dimension_numbers<[1], [0], [0], [1], [0, 0, 1, 1], [], []>} : vector<24x8xbf16>, vector<8x512xbf16>, vector<24x512xf32> -> vector<24x512xf32>
    %93 = arith.mulf %69, %92 : vector<24x512xf32>
    %94 = arith.truncf %93 : vector<24x512xf32> to vector<24x512xbf16>
    %cst_57 = arith.constant dense<0.000000e+00> : vector<8x512xf32>
    %95 = tpu.matmul %1, %94, %cst_57 {dimension_numbers = #tpu.dot_dimension_numbers<[0], [0], [1], [1], [0, 1, 1, 1], [], []>} : vector<24x8xbf16>, vector<24x512xbf16>, vector<8x512xf32> -> vector<8x512xf32>
    %96 = arith.truncf %90 : vector<8x8xf32> to vector<8x8xbf16>
    %c0_58 = arith.constant 0 : index
    %c0_59 = arith.constant 0 : index
    %97 = vector.load %arg14[%c0_58, %c0_59] : memref<8x512xbf16, #tpu.memory_space<vmem>>, vector<8x512xbf16>
    %cst_60 = arith.constant dense<0.000000e+00> : vector<8x512xf32>
    %98 = tpu.matmul %96, %97, %cst_60 {dimension_numbers = #tpu.dot_dimension_numbers<[1], [0], [0], [1], [0, 0, 1, 1], [], []>} : vector<8x8xbf16>, vector<8x512xbf16>, vector<8x512xf32> -> vector<8x512xf32>
    %99 = arith.divf %95, %98 : vector<8x512xf32>
    %c0_61 = arith.constant 0 : index
    %c0_62 = arith.constant 0 : index
    %100 = vector.load %arg15[%c0_61, %c0_62] : memref<1x512xf32, #tpu.memory_space<vmem>>, vector<1x512xf32>
    %101 = vector.broadcast %100 : vector<1x512xf32> to vector<8x512xf32>
    %102 = arith.addf %99, %101 : vector<8x512xf32>
    %cst_63 = arith.constant 0.000000e+00 : f32
    %103 = vector.broadcast %cst_63 : f32 to vector<8x512xf32>
    %104 = arith.cmpf ogt, %102, %103 : vector<8x512xf32>
    %cst_64 = arith.constant 0.000000e+00 : f32
    %105 = vector.broadcast %cst_64 : f32 to vector<8x512xf32>
    %106 = arith.minimumf %102, %105 : vector<8x512xf32>
    %107 = math.exp %106 : vector<8x512xf32>
    %cst_65 = arith.constant 1.000000e+00 : f32
    %108 = vector.broadcast %cst_65 : f32 to vector<8x512xf32>
    %109 = arith.subf %107, %108 : vector<8x512xf32>
    %110 = arith.select %104, %102, %109 : vector<8x512xi1>, vector<8x512xf32>
    %111 = arith.truncf %110 : vector<8x512xf32> to vector<8x512xbf16>
    %c0_66 = arith.constant 0 : index
    %c0_67 = arith.constant 0 : index
    %112 = vector.load %arg16[%c0_66, %c0_67] : memref<512x256xbf16, #tpu.memory_space<vmem>>, vector<512x256xbf16>
    %cst_68 = arith.constant dense<0.000000e+00> : vector<8x256xf32>
    %113 = tpu.matmul %111, %112, %cst_68 {dimension_numbers = #tpu.dot_dimension_numbers<[1], [0], [0], [1], [0, 0, 1, 1], [], []>} : vector<8x512xbf16>, vector<512x256xbf16>, vector<8x256xf32> -> vector<8x256xf32>
    %c0_69 = arith.constant 0 : index
    %c0_70 = arith.constant 0 : index
    %114 = vector.load %arg17[%c0_69, %c0_70] : memref<1x256xf32, #tpu.memory_space<vmem>>, vector<1x256xf32>
    %115 = vector.broadcast %114 : vector<1x256xf32> to vector<8x256xf32>
    %116 = arith.addf %113, %115 : vector<8x256xf32>
    %117 = vector.extract_strided_slice %116 {offsets = [0, 0], sizes = [8, 128], strides = [1, 1]} : vector<8x256xf32> to vector<8x128xf32>
    %118 = vector.extract_strided_slice %116 {offsets = [0, 128], sizes = [8, 128], strides = [1, 1]} : vector<8x256xf32> to vector<8x128xf32>
    %c0_71 = arith.constant 0 : index
    %c0_72 = arith.constant 0 : index
    %119 = vector.load %arg18[%c0_71, %c0_72] : memref<3x128xbf16, #tpu.memory_space<vmem>>, vector<3x128xbf16>
    %cst_73 = arith.constant dense<0.000000e+00> : vector<24x128xf32>
    %120 = tpu.matmul %3, %119, %cst_73 {dimension_numbers = #tpu.dot_dimension_numbers<[1], [0], [0], [1], [0, 0, 1, 1], [], []>} : vector<24x3xbf16>, vector<3x128xbf16>, vector<24x128xf32> -> vector<24x128xf32>
    %121 = arith.truncf %117 : vector<8x128xf32> to vector<8x128xbf16>
    %cst_74 = arith.constant dense<0.000000e+00> : vector<24x128xf32>
    %122 = tpu.matmul %0, %121, %cst_74 {dimension_numbers = #tpu.dot_dimension_numbers<[1], [0], [0], [1], [0, 0, 1, 1], [], []>} : vector<24x8xbf16>, vector<8x128xbf16>, vector<24x128xf32> -> vector<24x128xf32>
    %123 = arith.truncf %118 : vector<8x128xf32> to vector<8x128xbf16>
    %cst_75 = arith.constant dense<0.000000e+00> : vector<24x128xf32>
    %124 = tpu.matmul %1, %123, %cst_75 {dimension_numbers = #tpu.dot_dimension_numbers<[1], [0], [0], [1], [0, 0, 1, 1], [], []>} : vector<24x8xbf16>, vector<8x128xbf16>, vector<24x128xf32> -> vector<24x128xf32>
    %125 = arith.addf %122, %124 : vector<24x128xf32>
    %126 = arith.addf %125, %120 : vector<24x128xf32>
    %cst_76 = arith.constant 0.000000e+00 : f32
    %127 = vector.broadcast %cst_76 : f32 to vector<24x128xf32>
    %128 = arith.cmpf ogt, %126, %127 : vector<24x128xf32>
    %cst_77 = arith.constant 2.000000e-01 : f32
    %129 = vector.broadcast %cst_77 : f32 to vector<24x128xf32>
    %130 = arith.mulf %129, %126 : vector<24x128xf32>
    %131 = arith.select %128, %126, %130 : vector<24x128xi1>, vector<24x128xf32>
    %132 = arith.truncf %131 : vector<24x128xf32> to vector<24x128xbf16>
    %c0_78 = arith.constant 0 : index
    %c0_79 = arith.constant 0 : index
    %133 = vector.load %arg19[%c0_78, %c0_79] : memref<128x4xbf16, #tpu.memory_space<vmem>>, vector<128x4xbf16>
    %cst_80 = arith.constant dense<0.000000e+00> : vector<24x4xf32>
    %134 = tpu.matmul %132, %133, %cst_80 {dimension_numbers = #tpu.dot_dimension_numbers<[1], [0], [0], [1], [0, 0, 1, 1], [], []>} : vector<24x128xbf16>, vector<128x4xbf16>, vector<24x4xf32> -> vector<24x4xf32>
    %cst_81 = arith.constant dense<0xFF800000> : vector<4xf32>
    %135 = vector.multi_reduction <maximumf>, %134, %cst_81 [0] : vector<24x4xf32> to vector<4xf32>
    %136 = vector.shape_cast %135 : vector<4xf32> to vector<1x4xf32>
    %137 = vector.broadcast %136 : vector<1x4xf32> to vector<24x4xf32>
    %138 = arith.subf %134, %137 : vector<24x4xf32>
    %139 = math.exp %138 : vector<24x4xf32>
    %140 = arith.truncf %139 : vector<24x4xf32> to vector<24x4xbf16>
    %cst_82 = arith.constant dense<0.000000e+00> : vector<8x4xf32>
    %141 = tpu.matmul %1, %140, %cst_82 {dimension_numbers = #tpu.dot_dimension_numbers<[0], [0], [1], [1], [0, 1, 1, 1], [], []>} : vector<24x8xbf16>, vector<24x4xbf16>, vector<8x4xf32> -> vector<8x4xf32>
    %cst_83 = arith.constant 1.000000e-16 : f32
    %142 = vector.broadcast %cst_83 : f32 to vector<8x4xf32>
    %143 = arith.addf %141, %142 : vector<8x4xf32>
    %c0_84 = arith.constant 0 : index
    %c0_85 = arith.constant 0 : index
    %144 = vector.load %arg20[%c0_84, %c0_85] : memref<4x128xbf16, #tpu.memory_space<vmem>>, vector<4x128xbf16>
    %cst_86 = arith.constant dense<0.000000e+00> : vector<24x128xf32>
    %145 = tpu.matmul %140, %144, %cst_86 {dimension_numbers = #tpu.dot_dimension_numbers<[1], [0], [0], [1], [0, 0, 1, 1], [], []>} : vector<24x4xbf16>, vector<4x128xbf16>, vector<24x128xf32> -> vector<24x128xf32>
    %146 = arith.mulf %122, %145 : vector<24x128xf32>
    %147 = arith.truncf %146 : vector<24x128xf32> to vector<24x128xbf16>
    %cst_87 = arith.constant dense<0.000000e+00> : vector<8x128xf32>
    %148 = tpu.matmul %1, %147, %cst_87 {dimension_numbers = #tpu.dot_dimension_numbers<[0], [0], [1], [1], [0, 1, 1, 1], [], []>} : vector<24x8xbf16>, vector<24x128xbf16>, vector<8x128xf32> -> vector<8x128xf32>
    %149 = arith.truncf %143 : vector<8x4xf32> to vector<8x4xbf16>
    %c0_88 = arith.constant 0 : index
    %c0_89 = arith.constant 0 : index
    %150 = vector.load %arg20[%c0_88, %c0_89] : memref<4x128xbf16, #tpu.memory_space<vmem>>, vector<4x128xbf16>
    %cst_90 = arith.constant dense<0.000000e+00> : vector<8x128xf32>
    %151 = tpu.matmul %149, %150, %cst_90 {dimension_numbers = #tpu.dot_dimension_numbers<[1], [0], [0], [1], [0, 0, 1, 1], [], []>} : vector<8x4xbf16>, vector<4x128xbf16>, vector<8x128xf32> -> vector<8x128xf32>
    %152 = arith.divf %148, %151 : vector<8x128xf32>
    %c0_91 = arith.constant 0 : index
    %c0_92 = arith.constant 0 : index
    %153 = vector.load %arg21[%c0_91, %c0_92] : memref<1x128xf32, #tpu.memory_space<vmem>>, vector<1x128xf32>
    %154 = vector.broadcast %153 : vector<1x128xf32> to vector<8x128xf32>
    %155 = arith.addf %152, %154 : vector<8x128xf32>
    %cst_93 = arith.constant 0.000000e+00 : f32
    %156 = vector.broadcast %cst_93 : f32 to vector<8x128xf32>
    %157 = arith.cmpf ogt, %155, %156 : vector<8x128xf32>
    %cst_94 = arith.constant 0.000000e+00 : f32
    %158 = vector.broadcast %cst_94 : f32 to vector<8x128xf32>
    %159 = arith.minimumf %155, %158 : vector<8x128xf32>
    %160 = math.exp %159 : vector<8x128xf32>
    %cst_95 = arith.constant 1.000000e+00 : f32
    %161 = vector.broadcast %cst_95 : f32 to vector<8x128xf32>
    %162 = arith.subf %160, %161 : vector<8x128xf32>
    %163 = arith.select %157, %155, %162 : vector<8x128xi1>, vector<8x128xf32>
    %164 = arith.truncf %163 : vector<8x128xf32> to vector<8x128xbf16>
    %c0_96 = arith.constant 0 : index
    %c0_97 = arith.constant 0 : index
    %165 = vector.load %arg22[%c0_96, %c0_97] : memref<128x8xbf16, #tpu.memory_space<vmem>>, vector<128x8xbf16>
    %cst_98 = arith.constant dense<0.000000e+00> : vector<8x8xf32>
    %166 = tpu.matmul %164, %165, %cst_98 {dimension_numbers = #tpu.dot_dimension_numbers<[1], [0], [0], [1], [0, 0, 1, 1], [], []>} : vector<8x128xbf16>, vector<128x8xbf16>, vector<8x8xf32> -> vector<8x8xf32>
    %c0_99 = arith.constant 0 : index
    %c0_100 = arith.constant 0 : index
    %167 = vector.load %arg23[%c0_99, %c0_100] : memref<1x8xf32, #tpu.memory_space<vmem>>, vector<1x8xf32>
    %168 = vector.broadcast %167 : vector<1x8xf32> to vector<8x8xf32>
    %169 = arith.addf %166, %168 : vector<8x8xf32>
    %170 = vector.extract_strided_slice %169 {offsets = [0, 0], sizes = [8, 4], strides = [1, 1]} : vector<8x8xf32> to vector<8x4xf32>
    %171 = vector.extract_strided_slice %169 {offsets = [0, 4], sizes = [8, 4], strides = [1, 1]} : vector<8x8xf32> to vector<8x4xf32>
    %c0_101 = arith.constant 0 : index
    %c0_102 = arith.constant 0 : index
    %172 = vector.load %arg24[%c0_101, %c0_102] : memref<3x4xbf16, #tpu.memory_space<vmem>>, vector<3x4xbf16>
    %cst_103 = arith.constant dense<0.000000e+00> : vector<24x4xf32>
    %173 = tpu.matmul %3, %172, %cst_103 {dimension_numbers = #tpu.dot_dimension_numbers<[1], [0], [0], [1], [0, 0, 1, 1], [], []>} : vector<24x3xbf16>, vector<3x4xbf16>, vector<24x4xf32> -> vector<24x4xf32>
    %174 = arith.truncf %170 : vector<8x4xf32> to vector<8x4xbf16>
    %cst_104 = arith.constant dense<0.000000e+00> : vector<24x4xf32>
    %175 = tpu.matmul %0, %174, %cst_104 {dimension_numbers = #tpu.dot_dimension_numbers<[1], [0], [0], [1], [0, 0, 1, 1], [], []>} : vector<24x8xbf16>, vector<8x4xbf16>, vector<24x4xf32> -> vector<24x4xf32>
    %176 = arith.truncf %171 : vector<8x4xf32> to vector<8x4xbf16>
    %cst_105 = arith.constant dense<0.000000e+00> : vector<24x4xf32>
    %177 = tpu.matmul %1, %176, %cst_105 {dimension_numbers = #tpu.dot_dimension_numbers<[1], [0], [0], [1], [0, 0, 1, 1], [], []>} : vector<24x8xbf16>, vector<8x4xbf16>, vector<24x4xf32> -> vector<24x4xf32>
    %178 = arith.addf %175, %177 : vector<24x4xf32>
    %179 = arith.addf %178, %173 : vector<24x4xf32>
    %cst_106 = arith.constant 0.000000e+00 : f32
    %180 = vector.broadcast %cst_106 : f32 to vector<24x4xf32>
    %181 = arith.cmpf ogt, %179, %180 : vector<24x4xf32>
    %cst_107 = arith.constant 2.000000e-01 : f32
    %182 = vector.broadcast %cst_107 : f32 to vector<24x4xf32>
    %183 = arith.mulf %182, %179 : vector<24x4xf32>
    %184 = arith.select %181, %179, %183 : vector<24x4xi1>, vector<24x4xf32>
    %185 = arith.truncf %184 : vector<24x4xf32> to vector<24x4xbf16>
    %c0_108 = arith.constant 0 : index
    %c0_109 = arith.constant 0 : index
    %186 = vector.load %arg25[%c0_108, %c0_109] : memref<4x1xbf16, #tpu.memory_space<vmem>>, vector<4x1xbf16>
    %cst_110 = arith.constant dense<0.000000e+00> : vector<24x1xf32>
    %187 = tpu.matmul %185, %186, %cst_110 {dimension_numbers = #tpu.dot_dimension_numbers<[1], [0], [0], [1], [0, 0, 1, 1], [], []>} : vector<24x4xbf16>, vector<4x1xbf16>, vector<24x1xf32> -> vector<24x1xf32>
    %cst_111 = arith.constant dense<0xFF800000> : vector<1xf32>
    %188 = vector.multi_reduction <maximumf>, %187, %cst_111 [0] : vector<24x1xf32> to vector<1xf32>
    %189 = vector.shape_cast %188 : vector<1xf32> to vector<1x1xf32>
    %190 = vector.broadcast %189 : vector<1x1xf32> to vector<24x1xf32>
    %191 = arith.subf %187, %190 : vector<24x1xf32>
    %192 = math.exp %191 : vector<24x1xf32>
    %193 = arith.truncf %192 : vector<24x1xf32> to vector<24x1xbf16>
    %cst_112 = arith.constant dense<0.000000e+00> : vector<8x1xf32>
    %194 = tpu.matmul %1, %193, %cst_112 {dimension_numbers = #tpu.dot_dimension_numbers<[0], [0], [1], [1], [0, 1, 1, 1], [], []>} : vector<24x8xbf16>, vector<24x1xbf16>, vector<8x1xf32> -> vector<8x1xf32>
    %cst_113 = arith.constant 1.000000e-16 : f32
    %195 = vector.broadcast %cst_113 : f32 to vector<8x1xf32>
    %196 = arith.addf %194, %195 : vector<8x1xf32>
    %197 = vector.broadcast %192 : vector<24x1xf32> to vector<24x4xf32>
    %198 = arith.mulf %175, %197 : vector<24x4xf32>
    %199 = arith.truncf %198 : vector<24x4xf32> to vector<24x4xbf16>
    %cst_114 = arith.constant dense<0.000000e+00> : vector<8x4xf32>
    %200 = tpu.matmul %1, %199, %cst_114 {dimension_numbers = #tpu.dot_dimension_numbers<[0], [0], [1], [1], [0, 1, 1, 1], [], []>} : vector<24x8xbf16>, vector<24x4xbf16>, vector<8x4xf32> -> vector<8x4xf32>
    %201 = vector.broadcast %196 : vector<8x1xf32> to vector<8x4xf32>
    %202 = arith.divf %200, %201 : vector<8x4xf32>
    %c0_115 = arith.constant 0 : index
    %c0_116 = arith.constant 0 : index
    %203 = vector.load %arg27[%c0_115, %c0_116] : memref<1x4xf32, #tpu.memory_space<vmem>>, vector<1x4xf32>
    %204 = vector.broadcast %203 : vector<1x4xf32> to vector<8x4xf32>
    %205 = arith.addf %202, %204 : vector<8x4xf32>
    %c0_117 = arith.constant 0 : index
    %c0_118 = arith.constant 0 : index
    %206 = vector.load %arg28[%c0_117, %c0_118] : memref<8x4xf32, #tpu.memory_space<vmem>>, vector<8x4xf32>
    tpu.vector_store %arg28[%c0_117, %c0_118], %205 {strides = array<i32>} : memref<8x4xf32, #tpu.memory_space<vmem>>, vector<8x4xf32>,
    %cst_119 = arith.constant 1.000000e+00 : f32
    %207 = vector.broadcast %cst_119 : f32 to vector<8x1xf32>
    %208 = arith.divf %207, %196 : vector<8x1xf32>
    %209 = arith.truncf %208 : vector<8x1xf32> to vector<8x1xbf16>
    %cst_120 = arith.constant dense<0.000000e+00> : vector<24x1xf32>
    %210 = tpu.matmul %1, %209, %cst_120 {dimension_numbers = #tpu.dot_dimension_numbers<[1], [0], [0], [1], [0, 0, 1, 1], [], []>} : vector<24x8xbf16>, vector<8x1xbf16>, vector<24x1xf32> -> vector<24x1xf32>
    %211 = arith.mulf %192, %210 : vector<24x1xf32>
    %c0_121 = arith.constant 0 : index
    %c0_122 = arith.constant 0 : index
    %212 = vector.load %arg29[%c0_121, %c0_122] : memref<24x1xf32, #tpu.memory_space<vmem>>, vector<24x1xf32>
    tpu.vector_store %arg29[%c0_121, %c0_122], %211 {strides = array<i32>} : memref<24x1xf32, #tpu.memory_space<vmem>>, vector<24x1xf32>,
    return
  }
}

</mosaic_0001>

<bundles_post_ra>
// kernel: _lambda_.1
= control target key start
LH: loop header
LB: loop body
LE: loop exit
PB: predicated region body
PF: predicated region fallthrough
CT: control target
= control target key end

     0   :  { %v138_v0 = vlaneseq  ;;  %s5165_s3 = smov 4   ;;  %v5166_v1 = vmov 1966171168   ;;  %vm175_vm0 = vcmask 1040384   ;;  %v5167_v4 = vmov 0   ;;  %s5168_s10 = smov 6   ;;  %s5922_s0 = inlined_call_operand.smem [shape: u32[30], index: -1, kind: input, shape index: {}] }
   0x1   :  { %s4193_s6 = sld [smem:[%s5922_s0 + %s5165_s3]]   ;;  %v158_v2 = vunpack.c.l.s4 %v5166_v1  ;;  %214 = vmatprep.mubr.bf16.mxu0 %v5167_v4  ;;  %4943 = vset.pattern.permute.xlu1 %v5167_v4  ;;  %vm231_vm1 = vcmask 1041408   ;;  %v5169_v6 = vmov 65535   ;;  %s5170_s14 = smov 3   ;;  %vm224_vm2 = vcmask 23552  }
   0x2   :  { %s1_s9 = sld [smem:[%s5922_s0]]   ;;  %v5211_v3 = vshrl.u32 %v138_v0, 7  ;;  %v232_v7 = vsel %vm175_vm0, 4294967295, %v5169_v6  ;;  %vm171_vm3 = vcmask 15360   ;;  %s5171_s18 = smov 1   ;;  %vm294_vm4 = vcmask 64512  }
   0x3   :  { %s4195_s13 = sld [smem:[%s5922_s0 + %s5168_s10]]   ;;  %v159_v5 = vunpack.c.0.s8 %v158_v2  ;;  %v5224_v9 = vsel %vm231_vm1, %v232_v7, 0  ;;  %s5172_s22 = smov 2   ;;  %vm301_vm5 = vcmask 1043456   ;;  %vm5176_vm9 = vmmov 0  }
   0x4   :  { %s4192_s17 = sld [smem:[%s5922_s0 + %s5170_s14]]   ;;  %s5173_s26 = smov 7   ;;  %v5262_v27 = vsub.s32 0, %v5211_v3  ;;  %v5265_v29 = vsub.s32 1, %v5211_v3  ;;  %vm588_vm10 = vcmask 195584  }
   0x5   :  { %v162_v8 = vsub.s32 %v159_v5, %v5211_v3  ;;  %s5240_s21 = sld [smem:[%s5922_s0 + %s5171_s18]]   ;;  %s5174_s30 = smov 5  }
   0x6   :  { %s5245_s25 = sld [smem:[%s5922_s0 + %s5172_s22]]   ;;  %s5177_s4 = smov 8  }
   0x7   :  { %v4218_v10 = vld.sshfl [vmem:[%s4193_s6] sm:$0x11 pattern:$0x75316420]  ;;  %s5255_s29 = sld [smem:[%s5922_s0 + %s5173_s26]]   ;;  %s5178_s8 = smov 10  }
   0x8   :  { %v156_v11 = vcombine.high %v4218_v10, %v4218_v10  ;;  %v163_v12 = vrot.slane %v4218_v10, %v162_v8  ;;  %v133_v13 = vld [vmem:[%s1_s9] sm:$0xff]  ;;  %s4194_s3 = sld [smem:[%s5922_s0 + %s5174_s30]]   ;;  %s5179_s12 = smov 9  }
   0x9   :  { %v223_v14 = vld [vmem:[%s4195_s13] sm:$0x3]  ;;  %v134_v23 = vpack.c.bf16 %v133_v13, %v133_v13  ;;  %s4197_s7 = sld [smem:[%s5922_s0 + %s5177_s4]]   ;;  %s5180_s16 = smov 12  }
   0xa   :  { %v235_v15 = vand.u32 %v5224_v9, %v223_v14  ;;  %v128_v16 = vld [vmem:[%s4192_s17] sm:$0xff]  ;;  %v129_v17 = vld [vmem:[%s4192_s17 + $0x8] sm:$0xff]  ;;  %v130_v18 = vld [vmem:[%s4192_s17 + $0x10] sm:$0xff]  ;;  %v170_v19 = vrot.slane %v156_v11, %v162_v8  ;;  %v177_v20 = vsel %vm175_vm0, %v163_v12, 0  ;;  %v5175_v8 = vmov 0.0   ;;  %s5334_s11 = sld [smem:[%s5922_s0 + %s5178_s8]]   ;;  %s5182_s20 = smov 13  }
   0xb   :  { %v5228_v21 = vpack.c.bf16 %v129_v17, %v128_v16  ;;  %v5230_v22 = vpack.c.bf16 %v130_v18, %v130_v18  ;;  %v4945_v24 = vld [vmem:[%s5240_s21] sm:$0xff]   ;;  %v5273_v42 = vld [vmem:[%s5240_s21 + $0x8] ss:$0 sps:$4 sm:$0xff]   ;;  %s4198_s15 = sld [smem:[%s5922_s0 + %s5179_s12]]   ;;  %s5183_s26 = smov 11  }
   0xc   :  { %4637 = vmatprep.subr.bf16.mxu1 %v235_v15  ;;  %4219 = vmatprep.subr.msk.bf16.mxu0 %vm175_vm0, %v170_v19  ;;  %v4947_v25 = vld [vmem:[%s5245_s25] sm:$0xff]   ;;  %v4948_v26 = vld [vmem:[%s5245_s25 + $0x8] ss:$0 sps:$4 sm:$0xff]   ;;  %s4201_s19 = sld [smem:[%s5922_s0 + %s5180_s16]]   ;;  %s5184_s30 = smov 14  }
   0xd   :  { %4638 = vmatpush3.bf16.msra.mxu1 %v235_v15  ;;  %183 = vmatpush1.bf16.msra.mxu0 %v177_v20  ;;  %v4949_v39 = vld [vmem:[%s5255_s29] sm:$0xff]   ;;  %v4950_v44 = vld [vmem:[%s5255_s29 + $0x8] sm:$0xff]   ;;  %v4951_v45 = vld [vmem:[%s5255_s29 + $0x10] sm:$0xff]   ;;  %s5458_s24 = sld [smem:[%s5922_s0 + %s5182_s20]]   ;;  %s5185_s4 = smov 16  }
   0xe   :  { %4639 = vmatprep.mubr.msk.bf16.mxu1 %vm224_vm2, %v5228_v21  ;;  %572 = vxpose.xlu0.c.b16.start [1/2] (short) (narrow) %v4947_v25, 16  ;;  %v136_v28 = vld [vmem:[%s4194_s3] sm:$0x3]  ;;  %v4952_v46 = vld [vmem:[%s5255_s29 + $0x18] sm:$0xff]   ;;  %v4954_v48 = vld [vmem:[%s5255_s29 + $0x28] sm:$0xff]   ;;  %s5587_s3 = sld [smem:[%s5922_s0 + %s5184_s30]]   ;;  %s5186_s8 = smov 18  }
   0xf   :  { %v141_v30 = vrot.slane %v136_v28, %v5262_v27  ;;  %v145_v31 = vrot.slane %v136_v28, %v5265_v29  ;;  %v4953_v47 = vld [vmem:[%s5255_s29 + $0x20] sm:$0xff]   ;;  %v4955_v49 = vld [vmem:[%s5255_s29 + $0x30] sm:$0xff]   ;;  %v4956_v50 = vld [vmem:[%s5255_s29 + $0x38] sm:$0xff]   ;;  %s4200_s29 = sld [smem:[%s5922_s0 + %s5183_s26]]   ;;  %s5187_s12 = smov 15  }
  0x10   :  { %4640 = vmatmul.mubr.msk.bf16.vlgmr.msra.gmra.mrb[0].mxu1 %vm224_vm2, %v5230_v22  ;;  %4220 = vmatmul.mubr.msk.bf16.vlgmr.msra.gmra.mrb[0].mxu0 %vm171_vm3, %v134_v23  ;;  %s5188_s16 = smov 19   ;;  %s5189_s20 = smov 17  }
  0x11   :  { %4645 = vmatprep.mubr.msk.bf16.mxu0 %vm294_vm4, %v4945_v24  ;;  %4651 = vmatprep.mubr.msk.bf16.mxu1 %vm294_vm4, %v4947_v25  ;;  %s5191_s28 = smov 22   ;;  %s5192_s2 = smov 21  }
  0x12   :  { %573 = vxpose.xlu0.c.b16.end [2/2] (short) (narrow) %v4948_v26, 16  ;;  %s4211_s1 = sld [smem:[%s5922_s0 + %s5191_s28]]   ;;  %s5193_s6 = smov 24  }
  0x13   :  { %s4210_s5 = sld [smem:[%s5922_s0 + %s5192_s2]]   ;;  %s5194_s10 = smov 23  }
  0x14   :  { %s4213_s9 = sld [smem:[%s5922_s0 + %s5193_s6]]   ;;  %s5195_s14 = smov 124  }
  0x15   :  { %s4212_s13 = sld [smem:[%s5922_s0 + %s5194_s10]]  }
  0x1b   :  { %4944 = vset.pattern.permute.xlu0 %v5167_v4 }
  0xe3   :  { %v216_v32 = vpop.f32.mrb[0].mxu0 }
  0xe4   :  { %v217_v33 = vadd.f32 %v216_v32, %v141_v30  ;;  %v218_v34 = vpop.f32.mrb[1].mxu0 }
  0xe5   :  { %v219_v35 = vadd.f32 %v218_v34, %v145_v31  ;;  %v220_v36 = vpop.f32.mrb[2].mxu0 }
  0xe6   :  { %v285_v37 = vpack.c.bf16 %v217_v33, %v217_v33  ;;  %v221_v38 = vpop.f32.mrb[3].mxu0 }
  0xe7   :  { %v353_v40 = vpack.c.bf16 %v219_v35, %v219_v35 }
  0xe8   :  { %v303_v41 = vsel %vm301_vm5, %v285_v37, 0  ;;  %4898 = vmatprep.subr.msk.bf16.mxu0 %vm301_vm5, %v285_v37 }
  0xe9   :  { %v369_v43 = vsel %vm301_vm5, %v353_v40, 0  ;;  %4644 = vmatpush3.bf16.msra.mxu0 %v303_v41  ;;  %4899 = vmatprep.subr.msk.bf16.mxu1 %vm301_vm5, %v353_v40  ;;  %v635_v40 = vld [vmem:[%s4197_s7] sm:$0xf]  ;;  %s5626_s7 = sld [smem:[%s5922_s0 + %s5185_s4]]  }
  0xea   :  { %4650 = vmatpush3.bf16.msra.mxu1 %v369_v43  ;;  %4655 = vmatprep.subr.bf16.mxu0 %v4949_v39  ;;  %v5308_v43 = vpop.trf.xlu0 }
  0xeb   :  { %4675 = vmatprep.subr.bf16.mxu1 %v5175_v8 }
  0xec   :  { %4646 = vmatmul.mubr.msk.bf16.vlgmr.msra.gmra.mrb[4].mxu0 %vm294_vm4, %v5273_v42 }
  0xed   :  { %4652 = vmatmul.mubr.msk.bf16.vlgmr.msra.gmra.mrb[0].mxu1 %vm294_vm4, %v4948_v26  ;;  %4656 = vmatpush3.bf16.msra.mxu0 %v4949_v39 }
  0xee   :  { %4657 = vmatprep.subr.bf16.mxu0 %v4950_v44  ;;  %4679 = vmatprep.mubr.msk.bf16.mxu1 %vm5176_vm9, %v5175_v8 }
  0xf1   :  { %4658 = vmatpush3.bf16.msra.mxu0 %v4950_v44  ;;  %v642_v44 = vsel %vm301_vm5, %v635_v40, 0 }
  0xf2   :  { %4659 = vmatprep.subr.bf16.mxu0 %v4951_v45 }
  0xf5   :  { %4660 = vmatpush3.bf16.msra.mxu0 %v4951_v45 }
  0xf6   :  { %4661 = vmatprep.subr.bf16.mxu0 %v4952_v46 }
  0xf9   :  { %4662 = vmatpush3.bf16.msra.mxu0 %v4952_v46 }
  0xfa   :  { %4663 = vmatprep.subr.bf16.mxu0 %v4953_v47 }
  0xfd   :  { %4664 = vmatpush3.bf16.msra.mxu0 %v4953_v47 }
  0xfe   :  { %4665 = vmatprep.subr.bf16.mxu0 %v4954_v48 }
 0x101   :  { %4666 = vmatpush3.bf16.msra.mxu0 %v4954_v48 }
 0x102   :  { %4667 = vmatprep.subr.bf16.mxu0 %v4955_v49 }
 0x105   :  { %4668 = vmatpush3.bf16.msra.mxu0 %v4955_v49 }
 0x106   :  { %4669 = vmatprep.subr.bf16.mxu0 %v4956_v50 }
 0x109   :  { %4670 = vmatpush3.bf16.msra.mxu0 %v4956_v50 }
 0x1bf   :  { %v5287_v51 = vpop.f32.mrb[4].mxu0 }
 0x1c0   :  { %v5289_v52 = vpop.f32.mrb[5].mxu0  ;;  %v4653_v53 = vpop.f32.mrb[0].mxu1 }
 0x1c1   :  { %v421_v54 = vadd.f32 %v4653_v53, %v5287_v51  ;;  %v4648_v55 = vpop.f32.mrb[6].mxu0  ;;  %v405_v56 = vpop.f32.mrb[1].mxu1 }
 0x1c2   :  { %v419_v57 = vadd.f32 %v405_v56, %v5289_v52  ;;  %v5293_v58 = vpop.f32.mrb[7].mxu0  ;;  %v4654_v59 = vpop.f32.mrb[2].mxu1 }
 0x1c3   :  { %v430_v60 = vmul.f32 0.2, %v421_v54  ;;  %v408_v61 = vpop.f32.mrb[3].mxu1  ;;  %vm427_vm6 = vcmp.gt.f32.partialorder %v421_v54, 0.0 }
 0x1c4   :  { %v428_v62 = vmul.f32 0.2, %v419_v57  ;;  %v420_v63 = vadd.f32 %v408_v61, %v5293_v58  ;;  %vm425_vm7 = vcmp.gt.f32.partialorder %v419_v57, 0.0 }
 0x1c5   :  { %v433_v1 = vsel %vm427_vm6, %v421_v54, %v430_v60 }
 0x1c6   :  { %vm426_vm8 = vcmp.gt.f32.partialorder %v420_v63, 0.0  ;;  %v429_v0 = vmul.f32 0.2, %v420_v63  ;;  %v431_v2 = vsel %vm425_vm7, %v419_v57, %v428_v62  ;;  %v435_v7 = vpack.c.bf16 %v433_v1, %v433_v1  ;;  %v805_v62 = vld [vmem:[%s5334_s11 + $0x20] sm:$0xff]  ;;  %v806_v1 = vld [vmem:[%s5334_s11 + $0x28] sm:$0xff] }
 0x1c8   :  { %v432_v5 = vsel %vm426_vm8, %v420_v63, %v429_v0  ;;  %v802_v63 = vld [vmem:[%s5334_s11 + $0x8] sm:$0xff] }
 0x1c9   :  { %v434_v6 = vpack.c.bf16 %v432_v5, %v431_v2  ;;  %v4248_v5 = vcombine.low %v802_v63, %v806_v1 }
 0x1cb   :  { %4671 = vmatprep.mubr.bf16.mxu0 %v434_v6  ;;  %v4249_v6 = vcombine.high %v802_v63, %v806_v1 }
 0x1cc   :  { %4672 = vmatmul.mubr.bf16.vlgmr.msra.gmra.mrb[8].mxu0 %v435_v7  ;;  %v809_v7 = vld [vmem:[%s5334_s11 + $0x40] sm:$0xff] }
 0x1cd   :  { %1259 = vmatprep.mubr.bf16.mxu0 %v5167_v4 }
 0x29f   :  { %v4673_v10 = vpop.f32.mrb[8].mxu0 }
 0x2a0   :  { %v534_v11 = vpop.f32.mrb[9].mxu0  ;;  %v550_v17 = vsel %vm294_vm4, %v4673_v10, -inf }
 0x2a1   :  { %v4674_v12 = vpop.f32.mrb[10].mxu0  ;;  %v548_v14 = vsel %vm294_vm4, %v534_v11, -inf }
 0x2a2   :  { %v537_v13 = vpop.f32.mrb[11].mxu0 }
 0x2a3   :  { %v549_v15 = vsel %vm294_vm4, %v537_v13, -inf }
 0x2a4   :  { %v551_v16 = vmax.f32 %v548_v14, %v549_v15 }
 0x2a6   :  { %v552_v18 = vmax.f32 %v551_v16, %v550_v17  ;;  %v817_v17 = vld [vmem:[%s5334_s11 + $0x80] sm:$0xff] }
 0x2a8   :  { %v553_v19 = vrot.slane %v552_v18, 4 }
 0x2aa   :  { %v554_v20 = vmax.f32 %v552_v18, %v553_v19  ;;  %v821_v18 = vld [vmem:[%s5334_s11 + $0xa0] sm:$0xff]  ;;  %v818_v19 = vld [vmem:[%s5334_s11 + $0x88] sm:$0xff] }
 0x2ac   :  { %v555_v23 = vrot.slane %v554_v20, 2 }
 0x2ae   :  { %v556_v24 = vmax.f32 %v554_v20, %v555_v23  ;;  %v4263_v20 = vcombine.high %v817_v17, %v821_v18  ;;  %v822_v23 = vld [vmem:[%s5334_s11 + $0xa8] sm:$0xff] }
 0x2b0   :  { %v557_v25 = vrot.slane %v556_v24, 1 }
 0x2b2   :  { %v558_v26 = vmax.f32 %v556_v24, %v557_v25  ;;  %v4262_v24 = vcombine.low %v817_v17, %v821_v18  ;;  %v4264_v25 = vcombine.low %v818_v19, %v822_v23 }
 0x2b4   :  { %v559_v28 = vsub.f32 %v534_v11, %v558_v26  ;;  %v560_v30 = vsub.f32 %v537_v13, %v558_v26  ;;  %v561_v31 = vsub.f32 %v4673_v10, %v558_v26  ;;  %v813_v10 = vld [vmem:[%s5334_s11 + $0x60] sm:$0xff]  ;;  %v810_v11 = vld [vmem:[%s5334_s11 + $0x48] sm:$0xff]  ;;  %v4265_v26 = vcombine.high %v818_v19, %v822_v23 }
 0x2b5   :  { %v4255_v12 = vcombine.high %v809_v7, %v813_v10  ;;  %v814_v13 = vld [vmem:[%s5334_s11 + $0x68] sm:$0xff]  ;;  %v4254_v14 = vcombine.low %v809_v7, %v813_v10 }
 0x2b6   :  { %v562_v32 = vmul.f32 1.442695, %v559_v28  ;;  %v564_v33 = vmul.f32 1.442695, %v560_v30  ;;  %v566_v34 = vmul.f32 1.442695, %v561_v31  ;;  %v4256_v15 = vcombine.low %v810_v11, %v814_v13 }
 0x2b7   :  { %v4257_v16 = vcombine.high %v810_v11, %v814_v13  ;;  %v825_v28 = vld [vmem:[%s5334_s11 + $0xc0] sm:$0xff]  ;;  %v826_v31 = vld [vmem:[%s5334_s11 + $0xc8] sm:$0xff] }
 0x2b8   :  { %5106 = vpow2.f32 %v562_v32  ;;  %v829_v30 = vld [vmem:[%s5334_s11 + $0xe0] sm:$0xff]  ;;  %v858_v7 = vld [vmem:[%s5334_s11 + $0x1c8] sm:$0xff] }
 0x2b9   :  { %5108 = vpow2.f32 %v564_v33  ;;  %v4270_v32 = vcombine.low %v825_v28, %v829_v30  ;;  %v4271_v33 = vcombine.high %v825_v28, %v829_v30  ;;  %v862_v10 = vld [vmem:[%s5334_s11 + $0x1e8] sm:$0xff] }
 0x2ba   :  { %5110 = vpow2.f32 %v566_v34  ;;  %v830_v34 = vld [vmem:[%s5334_s11 + $0xe8] sm:$0xff] }
 0x2c2   :  { %v5107_v35 = vpop.eup %5106 }
 0x2c3   :  { %v5109_v36 = vpop.eup %5108 }
 0x2c4   :  { %v5111_v37 = vpop.eup %5110  ;;  %v568_v38 = vpack.c.bf16 %v5109_v36, %v5107_v35  ;;  %v833_v35 = vld [vmem:[%s5334_s11 + $0x100] sm:$0xff] }
 0x2c5   :  { %v569_v39 = vpack.c.bf16 %v5111_v37, %v5111_v37  ;;  %v837_v36 = vld [vmem:[%s5334_s11 + $0x120] sm:$0xff]  ;;  %v4272_v37 = vcombine.low %v826_v31, %v830_v34 }
 0x2c6   :  { %4676 = vmatpush3.bf16.msra.mxu1 %v568_v38 }
 0x2c7   :  { %4677 = vmatprep.subr.bf16.mxu1 %v5175_v8  ;;  %v593_v41 = vsel %vm301_vm5, %v569_v39, 0 }
 0x2ca   :  { %4678 = vmatpush3.bf16.msra.mxu1 %v593_v41  ;;  %v838_v41 = vld [vmem:[%s5334_s11 + $0x128] sm:$0xff] }
 0x2cb   :  { %4900 = vmatprep.subr.msk.bf16.mxu1 %vm301_vm5, %v635_v40  ;;  %v834_v40 = vld [vmem:[%s5334_s11 + $0x108] sm:$0xff] }
 0x2cd   :  { %4680 = vmatmul.mubr.msk.bf16.vlgmr.msra.gmra.mrb[4].mxu1 %vm588_vm10, %v5308_v43 }
 0x2ce   :  { %4685 = vmatprep.mubr.msk.bf16.mxu1 %vm294_vm4, %v568_v38  ;;  %4684 = vmatpush3.bf16.msra.mxu1 %v642_v44  ;;  %v4273_v38 = vcombine.high %v826_v31, %v830_v34 }
 0x2cf   :  { %4689 = vmatprep.subr.bf16.mxu1 %v5175_v8 }
 0x2d5   :  { %4686 = vmatmul.mubr.msk.bf16.vlgmr.msra.gmra.mrb[8].mxu1 %vm294_vm4, %v569_v39  ;;  %v4279_v39 = vcombine.high %v833_v35, %v837_v36 }
 0x2d6   :  { %4693 = vmatprep.mubr.msk.bf16.mxu1 %vm5176_vm9, %v5175_v8 }
 0x3a0   :  { %v629_v45 = vpop.f32.mrb[4].mxu1 }
 0x3a1   :  { %v4681_v46 = vpop.f32.mrb[5].mxu1 }
 0x3a2   :  { %v632_v47 = vpop.f32.mrb[6].mxu1  ;;  %v845_v46 = vld [vmem:[%s5334_s11 + $0x160] sm:$0xff] }
 0x3a3   :  { %v4682_v48 = vpop.f32.mrb[7].mxu1  ;;  %v842_v47 = vld [vmem:[%s5334_s11 + $0x148] sm:$0xff] }
 0x3a4   :  { %v846_v48 = vld [vmem:[%s5334_s11 + $0x168] sm:$0xff] }
 0x3a8   :  { %v4687_v49 = vpop.f32.mrb[8].mxu1 }
 0x3a9   :  { %v694_v50 = vmul.f32 %v4687_v49, %v5287_v51  ;;  %v678_v53 = vpop.f32.mrb[9].mxu1  ;;  %v630_v51 = vadd.f32 1e-16, %v629_v45  ;;  %v841_v45 = vld [vmem:[%s5334_s11 + $0x140] sm:$0xff]  ;;  %v4278_v49 = vcombine.low %v833_v35, %v837_v36 }
 0x3aa   :  { %v692_v54 = vmul.f32 %v678_v53, %v5289_v52  ;;  %v4688_v55 = vpop.f32.mrb[10].mxu1  ;;  %v4287_v53 = vcombine.high %v841_v45, %v845_v46  ;;  %v4286_v63 = vcombine.low %v841_v45, %v845_v46 }
 0x3ab   :  { %v681_v56 = vpop.f32.mrb[11].mxu1  ;;  %v696_v60 = vpack.c.bf16 %v694_v50, %v694_v50  ;;  %v740_v52 = vpack.c.bf16 %v630_v51, %v630_v51  ;;  %v4280_v50 = vcombine.low %v834_v40, %v838_v41  ;;  %v853_v55 = vld [vmem:[%s5334_s11 + $0x1a0] sm:$0xff]  ;;  %v850_v51 = vld [vmem:[%s5334_s11 + $0x188] sm:$0xff] }
 0x3ac   :  { %v693_v57 = vmul.f32 %v681_v56, %v5293_v58  ;;  %v801_v58 = vld [vmem:[%s5334_s11] sm:$0xff]  ;;  %v5363_v56 = vld [vmem:[%s5334_s11 + $0x10] sm:$0xff] }
 0x3ad   :  { %v698_v61 = vsel %vm301_vm5, %v696_v60, 0  ;;  %v4247_v0 = vcombine.high %v801_v58, %v805_v62  ;;  %v4246_v2 = vcombine.low %v801_v58, %v805_v62  ;;  %v5369_v60 = vld [vmem:[%s5334_s11 + $0x18] sm:$0xff] }
 0x3ae   :  { %v695_v59 = vpack.c.bf16 %v693_v57, %v692_v54  ;;  %v849_v54 = vld [vmem:[%s5334_s11 + $0x180] sm:$0xff]  ;;  %v4289_v57 = vcombine.high %v842_v47, %v846_v48 }
 0x3af   :  { %1227 = vmatprep.subr.bf16.mxu0 %v4247_v0  ;;  %v4288_v0 = vcombine.low %v842_v47, %v846_v48  ;;  %v4295_v1 = vcombine.high %v849_v54, %v853_v55  ;;  %v4294_v11 = vcombine.low %v849_v54, %v853_v55  ;;  %v824_v54 = vld [vmem:[%s5334_s11 + $0xb8] sm:$0xff] }
 0x3b0   :  { %4690 = vmatpush3.bf16.msra.mxu1 %v695_v59  ;;  %1228 = vmatpush1.bf16.msra.mxu0 %v4246_v2  ;;  %v5366_v59 = vld [vmem:[%s5334_s11 + $0x30] sm:$0xff] }
 0x3b1   :  { %4691 = vmatprep.subr.bf16.mxu1 %v5175_v8  ;;  %1229 = vmatprep.subr.bf16.mxu0 %v4255_v12  ;;  %v4250_v58 = vcombine.low %v5363_v56, %v5366_v59  ;;  %v4251_v17 = vcombine.high %v5363_v56, %v5366_v59 }
 0x3b4   :  { %4692 = vmatpush3.bf16.msra.mxu1 %v698_v61  ;;  %1230 = vmatpush1.bf16.msra.mxu0 %v4254_v14  ;;  %v5372_v61 = vld [vmem:[%s5334_s11 + $0x38] sm:$0xff]  ;;  %v4305_v14 = vcombine.high %v858_v7, %v862_v10 }
 0x3b5   :  { %4697 = vmatprep.subr.bf16.mxu1 %v5175_v8  ;;  %1231 = vmatprep.subr.bf16.mxu0 %v4263_v20  ;;  %v4252_v62 = vcombine.low %v5369_v60, %v5372_v61  ;;  %v4253_v18 = vcombine.high %v5369_v60, %v5372_v61 }
 0x3b7   :  { %4694 = vmatmul.mubr.msk.bf16.vlgmr.msra.gmra.mrb[12].mxu1 %vm588_vm10, %v5308_v43 }
 0x3b8   :  { %4698 = vmatpush3.bf16.msra.mxu1 %v642_v44  ;;  %4699 = vmatprep.mubr.msk.bf16.mxu1 %vm5176_vm9, %v5175_v8  ;;  %v4281_v44 = vcombine.high %v834_v40, %v838_v41  ;;  %v815_v40 = vld [vmem:[%s5334_s11 + $0x70] sm:$0xff]  ;;  %v812_v41 = vld [vmem:[%s5334_s11 + $0x58] sm:$0xff] }
 0x3b9   :  { %1268 = vmatprep.subr.bf16.mxu1 %v4249_v6  ;;  %1232 = vmatpush1.bf16.msra.mxu0 %v4262_v24  ;;  %v861_v6 = vld [vmem:[%s5334_s11 + $0x1e0] sm:$0xff] }
 0x3ba   :  { %1233 = vmatprep.subr.bf16.mxu0 %v4271_v33 }
 0x3bd   :  { %1234 = vmatpush1.bf16.msra.mxu0 %v4270_v32  ;;  %v4244_v32 = vld [vmem:[%s4198_s15] ss:$0 sm:$0xff]  ;;  %s4204_s15 = sld [smem:[%s5922_s0 + %s5187_s12]]  }
 0x3be   :  { %1235 = vmatprep.subr.bf16.mxu0 %v4279_v39 }
 0x3bf   :  { %4700 = vmatmul.mubr.msk.bf16.vlgmr.msra.gmra.mrb[16].mxu1 %vm294_vm4, %v740_v52  ;;  %v854_v52 = vld [vmem:[%s5334_s11 + $0x1a8] sm:$0xff] }
 0x3c0   :  { %1300 = vmatprep.mubr.bf16.mxu1 %v5167_v4  ;;  %1269 = vmatpush1.bf16.msra.mxu1 %v4248_v5  ;;  %v4297_v2 = vcombine.high %v850_v51, %v854_v52  ;;  %v857_v5 = vld [vmem:[%s5334_s11 + $0x1c0] sm:$0xff]  ;;  %v4296_v12 = vcombine.low %v850_v51, %v854_v52 }
 0x3c1   :  { %1270 = vmatprep.subr.bf16.mxu1 %v4257_v16  ;;  %1236 = vmatpush1.bf16.msra.mxu0 %v4278_v49  ;;  %v4303_v13 = vcombine.high %v857_v5, %v861_v6  ;;  %v4304_v16 = vcombine.low %v858_v7, %v862_v10  ;;  %v819_v49 = vld [vmem:[%s5334_s11 + $0x90] sm:$0xff] }
 0x3c2   :  { %1237 = vmatprep.subr.bf16.mxu0 %v4287_v53  ;;  %v820_v53 = vld [vmem:[%s5334_s11 + $0x98] sm:$0xff] }
 0x3c3   :  { %v4269_v52 = vcombine.high %v820_v53, %v824_v54  ;;  %v4268_v59 = vcombine.low %v820_v53, %v824_v54 }
 0x3c4   :  { %1271 = vmatpush1.bf16.msra.mxu1 %v4256_v15  ;;  %v4302_v15 = vcombine.low %v857_v5, %v861_v6  ;;  %v836_v5 = vld [vmem:[%s5334_s11 + $0x118] sm:$0xff] }
 0x3c5   :  { %1272 = vmatprep.subr.bf16.mxu1 %v4265_v26  ;;  %1238 = vmatpush1.bf16.msra.mxu0 %v4286_v63  ;;  %v827_v63 = vld [vmem:[%s5334_s11 + $0xd0] sm:$0xff]  ;;  %v840_v6 = vld [vmem:[%s5334_s11 + $0x138] sm:$0xff] }
 0x3c6   :  { %1239 = vmatprep.subr.bf16.mxu0 %v4295_v1  ;;  %v828_v1 = vld [vmem:[%s5334_s11 + $0xd8] sm:$0xff] }
 0x3c8   :  { %1273 = vmatpush1.bf16.msra.mxu1 %v4264_v25 }
 0x3c9   :  { %1274 = vmatprep.subr.bf16.mxu1 %v4273_v38  ;;  %1240 = vmatpush1.bf16.msra.mxu0 %v4294_v11  ;;  %v811_v38 = vld [vmem:[%s5334_s11 + $0x50] sm:$0xff] }
 0x3ca   :  { %1241 = vmatprep.subr.bf16.mxu0 %v4303_v13  ;;  %v4259_v47 = vcombine.high %v811_v38, %v815_v40  ;;  %v4258_v55 = vcombine.low %v811_v38, %v815_v40  ;;  %v843_v13 = vld [vmem:[%s5334_s11 + $0x150] sm:$0xff] }
 0x3cc   :  { %1275 = vmatpush1.bf16.msra.mxu1 %v4272_v37 }
 0x3cd   :  { %1276 = vmatprep.subr.bf16.mxu1 %v4281_v44  ;;  %1242 = vmatpush1.bf16.msra.mxu0 %v4302_v15  ;;  %v816_v44 = vld [vmem:[%s5334_s11 + $0x78] sm:$0xff] }
 0x3ce   :  { %1309 = vmatprep.subr.bf16.mxu0 %v4251_v17  ;;  %v4261_v48 = vcombine.high %v812_v41, %v816_v44  ;;  %v844_v15 = vld [vmem:[%s5334_s11 + $0x158] sm:$0xff] }
 0x3d0   :  { %1277 = vmatpush1.bf16.msra.mxu1 %v4280_v50  ;;  %v823_v50 = vld [vmem:[%s5334_s11 + $0xb0] sm:$0xff] }
 0x3d1   :  { %1278 = vmatprep.subr.bf16.mxu1 %v4289_v57  ;;  %v4260_v57 = vcombine.low %v812_v41, %v816_v44  ;;  %v4267_v51 = vcombine.high %v819_v49, %v823_v50  ;;  %v4266_v56 = vcombine.low %v819_v49, %v823_v50  ;;  %v1391_v49 = vld [vmem:[%s4201_s19] sm:$0xff]  ;;  %s5751_s19 = sld [smem:[%s5922_s0 + %s5188_s16]]  }
 0x3d2   :  { %v1393_v53 = vcombine.high %v1391_v49, %v1391_v49 }
 0x3d4   :  { %1279 = vmatpush1.bf16.msra.mxu1 %v4288_v0  ;;  %v831_v0 = vld [vmem:[%s5334_s11 + $0xf0] sm:$0xff] }
 0x3d5   :  { %1280 = vmatprep.subr.bf16.mxu1 %v4297_v2  ;;  %v832_v2 = vld [vmem:[%s5334_s11 + $0xf8] sm:$0xff]  ;;  %v4275_v60 = vcombine.high %v827_v63, %v831_v0  ;;  %v4274_v7 = vcombine.low %v827_v63, %v831_v0 }
 0x3d6   :  { %v4277_v61 = vcombine.high %v828_v1, %v832_v2  ;;  %v4276_v10 = vcombine.low %v828_v1, %v832_v2  ;;  %v877_v1 = vsub.s32 2, %v5211_v3  ;;  %v865_v2 = vld [vmem:[%s4200_s29] sm:$0xff] }
 0x3d8   :  { %1281 = vmatpush1.bf16.msra.mxu1 %v4296_v12  ;;  %v4285_v12 = vcombine.high %v836_v5, %v840_v6 }
 0x3d9   :  { %1282 = vmatprep.subr.bf16.mxu1 %v4305_v14  ;;  %v847_v14 = vld [vmem:[%s5334_s11 + $0x170] sm:$0xff] }
 0x3dc   :  { %1283 = vmatpush1.bf16.msra.mxu1 %v4304_v16  ;;  %v848_v16 = vld [vmem:[%s5334_s11 + $0x178] sm:$0xff] }
 0x3dd   :  { %1350 = vmatprep.subr.bf16.mxu1 %v4253_v18  ;;  %v4284_v18 = vcombine.low %v836_v5, %v840_v6 }
 0x48a   :  { %v734_v19 = vpop.f32.mrb[12].mxu1 }
 0x48b   :  { %v4695_v20 = vpop.f32.mrb[13].mxu1 }
 0x48c   :  { %v737_v23 = vpop.f32.mrb[14].mxu1  ;;  %v4293_v20 = vcombine.high %v844_v15, %v848_v16 }
 0x48d   :  { %v4696_v24 = vpop.f32.mrb[15].mxu1  ;;  %v851_v23 = vld [vmem:[%s5334_s11 + $0x190] sm:$0xff] }
 0x48e   :  { %v855_v24 = vld [vmem:[%s5334_s11 + $0x1b0] sm:$0xff] }
 0x492   :  { %v778_v25 = vpop.f32.mrb[16].mxu1 }
 0x493   :  { %5112 = vrcp.f32 %v778_v25  ;;  %v4701_v26 = vpop.f32.mrb[17].mxu1  ;;  %v852_v25 = vld [vmem:[%s5334_s11 + $0x198] sm:$0xff] }
 0x494   :  { %v781_v28 = vpop.f32.mrb[18].mxu1  ;;  %v856_v26 = vld [vmem:[%s5334_s11 + $0x1b8] sm:$0xff] }
 0x495   :  { %v4702_v30 = vpop.f32.mrb[19].mxu1  ;;  %v4290_v28 = vcombine.low %v843_v13, %v847_v14  ;;  %v4300_v38 = vcombine.low %v852_v25, %v856_v26 }
 0x496   :  { %v4292_v30 = vcombine.low %v844_v15, %v848_v16 }
 0x49d   :  { %v5113_v31 = vpop.eup %5112 }
 0x49e   :  { %v785_v33 = vmul.f32 %v5113_v31, %v734_v19  ;;  %v4291_v19 = vcombine.high %v843_v13, %v847_v14  ;;  %v4299_v31 = vcombine.high %v851_v23, %v855_v24 }
 0x4a0   :  { %v793_v34 = vadd.f32 %v4244_v32, %v785_v33  ;;  %v4301_v32 = vcombine.high %v852_v25, %v856_v26  ;;  %v859_v33 = vld [vmem:[%s5334_s11 + $0x1d0] sm:$0xff]  ;;  %v5476_v26 = vld [vmem:[%s5240_s21] sm:$0xff]  }
 0x4a2   :  { %v795_v35 = vmin.f32 %v793_v34, 0.0  ;;  %vm794_vm11 = vcmp.gt.f32.partialorder %v793_v34, 0.0 }
 0x4a4   :  { %v796_v36 = vmul.f32 1.442695, %v795_v35  ;;  %v860_v35 = vld [vmem:[%s5334_s11 + $0x1d8] sm:$0xff] }
 0x4a6   :  { %5114 = vpow2.f32 %v796_v36  ;;  %v864_v36 = vld [vmem:[%s5334_s11 + $0x1f8] sm:$0xff] }
 0x4a7   :  { %v4309_v40 = vcombine.high %v860_v35, %v864_v36  ;;  %v4308_v44 = vcombine.low %v860_v35, %v864_v36 }
 0x4b0   :  { %v5115_v37 = vpop.eup %5114 }
 0x4b1   :  { %v4245_v39 = vadd.f32 -1.0, %v5115_v37  ;;  %v4298_v37 = vcombine.low %v851_v23, %v855_v24 }
 0x4b3   :  { %v799_v45 = vsel %vm794_vm11, %v793_v34, %v4245_v39  ;;  %v863_v34 = vld [vmem:[%s5334_s11 + $0x1f0] sm:$0xff] }
 0x4b4   :  { %v5395_v46 = vpack.c.bf16 %v799_v45, %v799_v45  ;;  %v4307_v39 = vcombine.high %v859_v33, %v863_v34  ;;  %v4306_v41 = vcombine.low %v859_v33, %v863_v34  ;;  %v5181_v45 = vmov 1983009808  }
 0x4b6   :  { %1260 = vmatmul.mubr.bf16.vlgmr.msra.gmra.mrb[12].mxu0 %v5395_v46  ;;  %1301 = vmatmul.mubr.bf16.vlgmr.msra.gmra.mrb[20].mxu1 %v5395_v46 }
 0x4b7   :  { %1310 = vmatpush1.bf16.msra.mxu0 %v4250_v58  ;;  %1351 = vmatpush1.bf16.msra.mxu1 %v4252_v62  ;;  %v835_v58 = vld [vmem:[%s5334_s11 + $0x110] sm:$0xff] }
 0x4b8   :  { %1311 = vmatprep.subr.bf16.mxu0 %v4259_v47  ;;  %1352 = vmatprep.subr.bf16.mxu1 %v4261_v48  ;;  %v839_v62 = vld [vmem:[%s5334_s11 + $0x130] sm:$0xff]  ;;  %v1395_v47 = vunpack.c.l.s4 %v5181_v45  ;;  %s4207_s11 = sld [smem:[%s5922_s0 + %s5186_s8]]  }
 0x4b9   :  { %1341 = vmatprep.mubr.bf16.mxu0 %v5167_v4  ;;  %1382 = vmatprep.mubr.bf16.mxu1 %v5167_v4  ;;  %v4283_v11 = vcombine.high %v835_v58, %v839_v62  ;;  %v4282_v17 = vcombine.low %v835_v58, %v839_v62 }
 0x4ba   :  { %v1396_v48 = vunpack.c.0.s8 %v1395_v47 }
 0x4bb   :  { %1312 = vmatpush1.bf16.msra.mxu0 %v4258_v55  ;;  %1353 = vmatpush1.bf16.msra.mxu1 %v4260_v57 }
 0x4bc   :  { %1313 = vmatprep.subr.bf16.mxu0 %v4267_v51  ;;  %1354 = vmatprep.subr.bf16.mxu1 %v4269_v52  ;;  %v1399_v50 = vsub.s32 %v1396_v48, %v5211_v3 }
 0x4be   :  { %v1400_v54 = vrot.slane %v1391_v49, %v1399_v50  ;;  %v1407_v55 = vrot.slane %v1393_v53, %v1399_v50 }
 0x4bf   :  { %1314 = vmatpush1.bf16.msra.mxu0 %v4266_v56  ;;  %1355 = vmatpush1.bf16.msra.mxu1 %v4268_v59  ;;  %v881_v56 = vsub.s32 3, %v5211_v3  ;;  %v870_v59 = vrot.slane %v865_v2, %v5262_v27 }
 0x4c0   :  { %1315 = vmatprep.subr.bf16.mxu0 %v4275_v60  ;;  %1356 = vmatprep.subr.bf16.mxu1 %v4277_v61  ;;  %v1408_v57 = vcombine.high %v1400_v54, %v1400_v54  ;;  %v1411_v63 = vand.u32 %v1400_v54, %v5224_v9  ;;  %v1417_v0 = vand.u32 %v1407_v55, %v5224_v9 }
 0x4c1   :  { %v878_v60 = vrot.slane %v865_v2, %v877_v1  ;;  %v874_v61 = vrot.slane %v865_v2, %v5265_v29  ;;  %v882_v58 = vrot.slane %v865_v2, %v881_v56 }
 0x4c2   :  { %v1414_v51 = vand.u32 %v1408_v57, %v5224_v9 }
 0x4c3   :  { %1316 = vmatpush1.bf16.msra.mxu0 %v4274_v7  ;;  %1357 = vmatpush1.bf16.msra.mxu1 %v4276_v10 }
 0x4c4   :  { %1317 = vmatprep.subr.bf16.mxu0 %v4283_v11  ;;  %1358 = vmatprep.subr.bf16.mxu1 %v4285_v12 }
 0x4c7   :  { %1318 = vmatpush1.bf16.msra.mxu0 %v4282_v17  ;;  %1359 = vmatpush1.bf16.msra.mxu1 %v4284_v18 }
 0x4c8   :  { %1319 = vmatprep.subr.bf16.mxu0 %v4291_v19  ;;  %1360 = vmatprep.subr.bf16.mxu1 %v4293_v20 }
 0x4cb   :  { %1320 = vmatpush1.bf16.msra.mxu0 %v4290_v28  ;;  %1361 = vmatpush1.bf16.msra.mxu1 %v4292_v30  ;;  %v885_v28 = vsub.s32 4, %v5211_v3  ;;  %v893_v30 = vsub.s32 6, %v5211_v3 }
 0x4cc   :  { %1321 = vmatprep.subr.bf16.mxu0 %v4299_v31  ;;  %1362 = vmatprep.subr.bf16.mxu1 %v4301_v32  ;;  %v889_v31 = vsub.s32 5, %v5211_v3  ;;  %v897_v32 = vsub.s32 7, %v5211_v3 }
 0x4cd   :  { %v886_v33 = vrot.slane %v865_v2, %v885_v28  ;;  %v894_v34 = vrot.slane %v865_v2, %v893_v30  ;;  %v4982_v28 = vld [vmem:[%s5458_s24 + $0x70] sm:$0xff]  }
 0x4ce   :  { %v890_v35 = vrot.slane %v865_v2, %v889_v31  ;;  %v898_v36 = vrot.slane %v865_v2, %v897_v32  ;;  %v4961_v2 = vld [vmem:[%s5458_s24 + $0x80] sm:$0xff]   ;;  %v4983_v30 = vld [vmem:[%s5458_s24 + $0xf0] sm:$0xff]  }
 0x4cf   :  { %1322 = vmatpush1.bf16.msra.mxu0 %v4298_v37  ;;  %1363 = vmatpush1.bf16.msra.mxu1 %v4300_v38  ;;  %v4984_v31 = vld [vmem:[%s5458_s24 + $0x30] sm:$0xff]  }
 0x4d0   :  { %1323 = vmatprep.subr.bf16.mxu0 %v4307_v39  ;;  %1364 = vmatprep.subr.bf16.mxu1 %v4309_v40  ;;  %v4985_v32 = vld [vmem:[%s5458_s24 + $0xb0] sm:$0xff]  }
 0x4d3   :  { %1324 = vmatpush1.bf16.msra.mxu0 %v4306_v41  ;;  %1365 = vmatpush1.bf16.msra.mxu1 %v4308_v44 }
 0x4d4   :  { %1422 = vmatprep.subr.bf16.mxu0 %v1414_v51  ;;  %v4959_v51 = vld [vmem:[%s5458_s24 + $0xc0] sm:$0xff]  }
 0x4d6   :  { %1342 = vmatmul.mubr.bf16.vlgmr.msra.gmra.mrb[16].mxu0 %v5395_v46  ;;  %1383 = vmatmul.mubr.bf16.vlgmr.msra.gmra.mrb[24].mxu1 %v5395_v46  ;;  %v1409_v46 = vcombine.high %v1407_v55, %v1407_v55 }
 0x4d7   :  { %1454 = vmatprep.mubr.bf16.mxu0 %v5167_v4  ;;  %1505 = vmatprep.mubr.bf16.mxu1 %v5167_v4 }
 0x4d8   :  { %v1420_v52 = vand.u32 %v1409_v46, %v5224_v9  ;;  %1423 = vmatpush1.bf16.msra.mxu0 %v1411_v63  ;;  %v4958_v46 = vld [vmem:[%s5458_s24 + $0x40] sm:$0xff]  }
 0x4da   :  { %1473 = vmatprep.subr.bf16.mxu1 %v1420_v52 }
 0x4db   :  { %1474 = vmatpush1.bf16.msra.mxu1 %v1417_v0  ;;  %v4960_v0 = vld [vmem:[%s5458_s24] sm:$0xff]  }
 0x4de   :  { %4310 = vmatmul.mubr.msk.bf16.vlgmr.msra.gmra.mrb[20].mxu0 %vm224_vm2, %v5228_v21  ;;  %4312 = vmatmul.mubr.msk.bf16.vlgmr.msra.gmra.mrb[28].mxu1 %vm224_vm2, %v5228_v21 }
 0x4df   :  { %1464 = vmatprep.mubr.bf16.mxu0 %v5167_v4  ;;  %1515 = vmatprep.mubr.bf16.mxu1 %v5167_v4 }
 0x4e6   :  { %4311 = vmatmul.mubr.msk.bf16.gmra.mrb[24].mxu0 %vm224_vm2, %v5230_v22  ;;  %4313 = vmatmul.mubr.msk.bf16.gmra.mrb[32].mxu1 %vm224_vm2, %v5230_v22 }
 0x4e7   :  { %1572 = vmatprep.mubr.bf16.mxu0 %v5167_v4  ;;  %1623 = vmatprep.mubr.bf16.mxu1 %v5167_v4 }
 0x589   :  { %v1261_v62 = vpop.f32.mrb[12].mxu0  ;;  %v1302_v5 = vpop.f32.mrb[20].mxu1 }
 0x58a   :  { %v1262_v6 = vadd.f32 %v1261_v62, %v870_v59  ;;  %v1303_v7 = vadd.f32 %v1302_v5, %v878_v60  ;;  %v1263_v10 = vpop.f32.mrb[13].mxu0  ;;  %v1304_v11 = vpop.f32.mrb[21].mxu1  ;;  %v4962_v59 = vld [vmem:[%s5458_s24 + $0x48] sm:$0xff]  }
 0x58b   :  { %v1264_v12 = vadd.f32 %v1263_v10, %v874_v61  ;;  %v1305_v13 = vadd.f32 %v1304_v11, %v882_v58  ;;  %v1265_v14 = vpop.f32.mrb[14].mxu0  ;;  %v1306_v15 = vpop.f32.mrb[22].mxu1  ;;  %v4963_v60 = vld [vmem:[%s5458_s24 + $0xc8] sm:$0xff]   ;;  %v5159_v61 = vld [vmem:[%s5245_s25] sm:$0xff]   ;;  %v4968_v10 = vld [vmem:[%s5458_s24 + $0x10] sm:$0xff]  }
 0x58c   :  { %v1524_v16 = vpack.c.bf16 %v1262_v6, %v1262_v6  ;;  %v1526_v17 = vpack.c.bf16 %v1303_v7, %v1303_v7  ;;  %v1266_v18 = vpop.f32.mrb[15].mxu0  ;;  %v1307_v19 = vpop.f32.mrb[23].mxu1  ;;  %v5160_v58 = vld [vmem:[%s5245_s25 + $0x8] ss:$0 sps:$4 sm:$0xff]   ;;  %v4966_v6 = vld [vmem:[%s5458_s24 + $0x50] sm:$0xff]   ;;  %v4972_v14 = vld [vmem:[%s5458_s24 + $0x18] sm:$0xff]  }
 0x58d   :  { %v1525_v20 = vpack.c.bf16 %v1264_v12, %v1264_v12  ;;  %v1527_v23 = vpack.c.bf16 %v1305_v13, %v1305_v13  ;;  %v4964_v62 = vld [vmem:[%s5458_s24 + $0x8] sm:$0xff]   ;;  %v4967_v7 = vld [vmem:[%s5458_s24 + $0xd0] sm:$0xff]   ;;  %v4970_v12 = vld [vmem:[%s5458_s24 + $0x58] sm:$0xff]  }
 0x58e   :  { %v1529_v24 = vsel %vm301_vm5, %v1524_v16, 0  ;;  %v1535_v25 = vsel %vm301_vm5, %v1526_v17, 0  ;;  %v4965_v5 = vld [vmem:[%s5458_s24 + $0x88] sm:$0xff]   ;;  %v4969_v11 = vld [vmem:[%s5458_s24 + $0x90] sm:$0xff]   ;;  %v4971_v13 = vld [vmem:[%s5458_s24 + $0xd8] sm:$0xff]  }
 0x58f   :  { %4314 = vmatprep.subr.msk.bf16.mxu0 %vm301_vm5, %v1525_v20  ;;  %4317 = vmatprep.subr.msk.bf16.mxu1 %vm301_vm5, %v1527_v23  ;;  %v4973_v15 = vld [vmem:[%s5458_s24 + $0x98] sm:$0xff]   ;;  %v4974_v16 = vld [vmem:[%s5458_s24 + $0x60] sm:$0xff]   ;;  %v4978_v20 = vld [vmem:[%s5458_s24 + $0x68] sm:$0xff]  }
 0x590   :  { %1541 = vmatpush1.bf16.msra.mxu0 %v1529_v24  ;;  %1592 = vmatpush1.bf16.msra.mxu1 %v1535_v25  ;;  %v4975_v17 = vld [vmem:[%s5458_s24 + $0xe0] sm:$0xff]   ;;  %v4979_v23 = vld [vmem:[%s5458_s24 + $0xe8] sm:$0xff]  }
 0x591   :  { %v4976_v18 = vld [vmem:[%s5458_s24 + $0x20] sm:$0xff]   ;;  %v4980_v24 = vld [vmem:[%s5458_s24 + $0x28] sm:$0xff]  }
 0x592   :  { %v4977_v19 = vld [vmem:[%s5458_s24 + $0xa0] sm:$0xff]   ;;  %v4981_v25 = vld [vmem:[%s5458_s24 + $0xa8] sm:$0xff]  }
 0x593   :  { %4315 = vmatmul.mubr.msk.bf16.vlgmr.msra.gmra.mrb[28].mxu0 %vm294_vm4, %v5476_v26  ;;  %4318 = vmatmul.mubr.msk.bf16.vlgmr.msra.gmra.mrb[36].mxu1 %vm294_vm4, %v5476_v26 }
 0x594   :  { %1582 = vmatprep.mubr.bf16.mxu0 %v5167_v4  ;;  %1633 = vmatprep.mubr.bf16.mxu1 %v5167_v4 }
 0x59b   :  { %4316 = vmatmul.mubr.msk.bf16.gmra.mrb[32].mxu0 %vm294_vm4, %v5273_v42  ;;  %4319 = vmatmul.mubr.msk.bf16.gmra.mrb[40].mxu1 %vm294_vm4, %v5273_v42 }
 0x59c   :  { %1690 = vmatprep.mubr.bf16.mxu0 %v5167_v4  ;;  %1741 = vmatprep.mubr.bf16.mxu1 %v5167_v4 }
 0x5a9   :  { %v1343_v37 = vpop.f32.mrb[16].mxu0  ;;  %v1384_v38 = vpop.f32.mrb[24].mxu1 }
 0x5aa   :  { %v1344_v42 = vadd.f32 %v1343_v37, %v886_v33  ;;  %v1385_v39 = vadd.f32 %v1384_v38, %v894_v34  ;;  %v1345_v40 = vpop.f32.mrb[17].mxu0  ;;  %v1386_v41 = vpop.f32.mrb[25].mxu1  ;;  %v4986_v33 = vld [vmem:[%s5458_s24 + $0x78] sm:$0xff]  }
 0x5ab   :  { %v1346_v44 = vadd.f32 %v1345_v40, %v890_v35  ;;  %v1387_v45 = vadd.f32 %v1386_v41, %v898_v36  ;;  %v1347_v47 = vpop.f32.mrb[18].mxu0  ;;  %v1388_v48 = vpop.f32.mrb[26].mxu1  ;;  %v4987_v34 = vld [vmem:[%s5458_s24 + $0xf8] sm:$0xff]  }
 0x5ac   :  { %v1642_v49 = vpack.c.bf16 %v1344_v42, %v1344_v42  ;;  %v1644_v50 = vpack.c.bf16 %v1385_v39, %v1385_v39  ;;  %v1348_v53 = vpop.f32.mrb[19].mxu0  ;;  %v1389_v54 = vpop.f32.mrb[27].mxu1  ;;  %v4988_v35 = vld [vmem:[%s5458_s24 + $0x38] sm:$0xff]  }
 0x5ad   :  { %v1643_v55 = vpack.c.bf16 %v1346_v44, %v1346_v44  ;;  %v1645_v57 = vpack.c.bf16 %v1387_v45, %v1387_v45  ;;  %v4989_v36 = vld [vmem:[%s5458_s24 + $0xb8] sm:$0xff]   ;;  %s4206_s24 = sld [smem:[%s5922_s0 + %s5189_s20]]  }
 0x5ae   :  { %v1647_v52 = vsel %vm301_vm5, %v1642_v49, 0  ;;  %v1653_v63 = vsel %vm301_vm5, %v1644_v50, 0 }
 0x5af   :  { %4320 = vmatprep.subr.msk.bf16.mxu0 %vm301_vm5, %v1643_v55  ;;  %4323 = vmatprep.subr.msk.bf16.mxu1 %vm301_vm5, %v1645_v57 }
 0x5b0   :  { %1659 = vmatpush1.bf16.msra.mxu0 %v1647_v52  ;;  %1710 = vmatpush1.bf16.msra.mxu1 %v1653_v63 }
 0x5b1   :  { %4518 = vmatprep.subr.bf16.mxu0 %v4958_v46  ;;  %4546 = vmatprep.subr.bf16.mxu1 %v4959_v51 }
 0x5b3   :  { %4321 = vmatmul.mubr.msk.bf16.vlgmr.msra.gmra.mrb[20].mxu0 %vm294_vm4, %v5159_v61  ;;  %4324 = vmatmul.mubr.msk.bf16.vlgmr.msra.gmra.mrb[28].mxu1 %vm294_vm4, %v5159_v61 }
 0x5b4   :  { %1700 = vmatprep.mubr.bf16.mxu0 %v5167_v4  ;;  %1751 = vmatprep.mubr.bf16.mxu1 %v5167_v4 }
 0x5b5   :  { %4519 = vmatpush3.bf16.msra.mxu0 %v4960_v0  ;;  %4547 = vmatpush3.bf16.msra.mxu1 %v4961_v2 }
 0x5b6   :  { %4520 = vmatprep.subr.bf16.mxu0 %v4962_v59  ;;  %4548 = vmatprep.subr.bf16.mxu1 %v4963_v60 }
 0x5b9   :  { %4521 = vmatpush3.bf16.msra.mxu0 %v4964_v62  ;;  %4549 = vmatpush3.bf16.msra.mxu1 %v4965_v5 }
 0x5ba   :  { %4522 = vmatprep.subr.bf16.mxu0 %v4966_v6  ;;  %4550 = vmatprep.subr.bf16.mxu1 %v4967_v7 }
 0x5bb   :  { %4322 = vmatmul.mubr.msk.bf16.gmra.mrb[24].mxu0 %vm294_vm4, %v5160_v58  ;;  %4325 = vmatmul.mubr.msk.bf16.gmra.mrb[32].mxu1 %vm294_vm4, %v5160_v58 }
 0x5bd   :  { %4523 = vmatpush3.bf16.msra.mxu0 %v4968_v10  ;;  %4551 = vmatpush3.bf16.msra.mxu1 %v4969_v11 }
 0x5be   :  { %4524 = vmatprep.subr.bf16.mxu0 %v4970_v12  ;;  %4552 = vmatprep.subr.bf16.mxu1 %v4971_v13 }
 0x5c1   :  { %4525 = vmatpush3.bf16.msra.mxu0 %v4972_v14  ;;  %4553 = vmatpush3.bf16.msra.mxu1 %v4973_v15 }
 0x5c2   :  { %4526 = vmatprep.subr.bf16.mxu0 %v4974_v16  ;;  %4554 = vmatprep.subr.bf16.mxu1 %v4975_v17 }
 0x5c5   :  { %4527 = vmatpush3.bf16.msra.mxu0 %v4976_v18  ;;  %4555 = vmatpush3.bf16.msra.mxu1 %v4977_v19 }
 0x5c6   :  { %4528 = vmatprep.subr.bf16.mxu0 %v4978_v20  ;;  %4556 = vmatprep.subr.bf16.mxu1 %v4979_v23 }
 0x5c9   :  { %4529 = vmatpush3.bf16.msra.mxu0 %v4980_v24  ;;  %4557 = vmatpush3.bf16.msra.mxu1 %v4981_v25 }
 0x5ca   :  { %4530 = vmatprep.subr.bf16.mxu0 %v4982_v28  ;;  %4558 = vmatprep.subr.bf16.mxu1 %v4983_v30 }
 0x5cd   :  { %4531 = vmatpush3.bf16.msra.mxu0 %v4984_v31  ;;  %4559 = vmatpush3.bf16.msra.mxu1 %v4985_v32 }
 0x5ce   :  { %4532 = vmatprep.subr.bf16.mxu0 %v4986_v33  ;;  %4560 = vmatprep.subr.bf16.mxu1 %v4987_v34 }
 0x5d1   :  { %4533 = vmatpush3.bf16.msra.mxu0 %v4988_v35  ;;  %4561 = vmatpush3.bf16.msra.mxu1 %v4989_v36 }
 0x5d2   :  { %4703 = vmatprep.subr.bf16.mxu0 %v5175_v8 }
 0x666   :  { %v5539_v37 = vpop.f32.mrb[28].mxu0  ;;  %v5541_v38 = vpop.f32.mrb[36].mxu1 }
 0x667   :  { %v5543_v42 = vpop.f32.mrb[29].mxu0  ;;  %v5545_v39 = vpop.f32.mrb[37].mxu1 }
 0x668   :  { %v5547_v40 = vpop.f32.mrb[30].mxu0  ;;  %v5549_v41 = vpop.f32.mrb[38].mxu1 }
 0x669   :  { %v5551_v44 = vpop.f32.mrb[31].mxu0  ;;  %v5553_v45 = vpop.f32.mrb[39].mxu1 }
 0x66e   :  { %v5555_v47 = vpop.f32.mrb[32].mxu0  ;;  %v5557_v48 = vpop.f32.mrb[40].mxu1 }
 0x66f   :  { %v5559_v49 = vpop.f32.mrb[33].mxu0  ;;  %v5561_v50 = vpop.f32.mrb[41].mxu1 }
 0x670   :  { %v1588_v53 = vpop.f32.mrb[34].mxu0  ;;  %v1639_v54 = vpop.f32.mrb[42].mxu1 }
 0x671   :  { %v1589_v55 = vpop.f32.mrb[35].mxu0  ;;  %v1640_v57 = vpop.f32.mrb[43].mxu1 }
 0x686   :  { %v1692_v46 = vpop.f32.mrb[20].mxu0  ;;  %v1743_v51 = vpop.f32.mrb[28].mxu1 }
 0x687   :  { %v1760_v52 = vadd.f32 %v1692_v46, %v5539_v37  ;;  %v1762_v63 = vadd.f32 %v1743_v51, %v5541_v38  ;;  %v1694_v0 = vpop.f32.mrb[21].mxu0  ;;  %v1745_v2 = vpop.f32.mrb[29].mxu1 }
 0x688   :  { %v1761_v59 = vadd.f32 %v1694_v0, %v5543_v42  ;;  %v1763_v60 = vadd.f32 %v1745_v2, %v5545_v39  ;;  %v1696_v61 = vpop.f32.mrb[22].mxu0  ;;  %v1747_v58 = vpop.f32.mrb[30].mxu1 }
 0x689   :  { %vm1784_vm12 = vcmp.gt.f32.partialorder %v1760_v52, 0.0  ;;  %v1796_v62 = vmul.f32 0.2, %v1760_v52  ;;  %vm1786_vm13 = vcmp.gt.f32.partialorder %v1762_v63, 0.0  ;;  %v1798_v5 = vmul.f32 0.2, %v1762_v63 }
 0x68a   :  { %vm1785_vm14 = vcmp.gt.f32.partialorder %v1761_v59, 0.0  ;;  %v1797_v6 = vmul.f32 0.2, %v1761_v59  ;;  %v1764_v7 = vadd.f32 %v1696_v61, %v5547_v40  ;;  %v1766_v10 = vadd.f32 %v1747_v58, %v5549_v41  ;;  %v1698_v11 = vpop.f32.mrb[23].mxu0  ;;  %v1749_v12 = vpop.f32.mrb[31].mxu1 }
 0x68b   :  { %vm1787_vm15 = vcmp.gt.f32.partialorder %v1763_v60, 0.0  ;;  %v1799_v13 = vmul.f32 0.2, %v1763_v60  ;;  %v1765_v14 = vadd.f32 %v1698_v11, %v5551_v44  ;;  %v1767_v15 = vadd.f32 %v1749_v12, %v5553_v45 }
 0x68c   :  { %vm1788_vm0 = vcmp.gt.f32.partialorder %v1764_v7, 0.0  ;;  %v1800_v16 = vmul.f32 0.2, %v1764_v7  ;;  %vm1790_vm3 = vcmp.gt.f32.partialorder %v1766_v10, 0.0  ;;  %v1802_v17 = vmul.f32 0.2, %v1766_v10 }
 0x68d   :  { %vm1789_vm6 = vcmp.gt.f32.partialorder %v1765_v14, 0.0  ;;  %v1801_v18 = vmul.f32 0.2, %v1765_v14  ;;  %vm1791_vm7 = vcmp.gt.f32.partialorder %v1767_v15, 0.0  ;;  %v1803_v19 = vmul.f32 0.2, %v1767_v15 }
 0x68e   :  { %v1808_v20 = vsel %vm1784_vm12, %v1760_v52, %v1796_v62  ;;  %v1810_v23 = vsel %vm1786_vm13, %v1762_v63, %v1798_v5  ;;  %v1812_v24 = vsel %vm1788_vm0, %v1764_v7, %v1800_v16  ;;  %v1814_v25 = vsel %vm1790_vm3, %v1766_v10, %v1802_v17  ;;  %v1702_v28 = vpop.f32.mrb[24].mxu0  ;;  %v1753_v30 = vpop.f32.mrb[32].mxu1  ;;  %v2245_v16 = vld [vmem:[%s5587_s3] sm:$0xff] }
 0x68f   :  { %v1820_v31 = vpack.c.bf16 %v1812_v24, %v1808_v20  ;;  %v1822_v32 = vpack.c.bf16 %v1814_v25, %v1810_v23  ;;  %v1768_v33 = vadd.f32 %v1702_v28, %v5555_v47  ;;  %v1770_v34 = vadd.f32 %v1753_v30, %v5557_v48  ;;  %v1704_v35 = vpop.f32.mrb[25].mxu0  ;;  %v1755_v36 = vpop.f32.mrb[33].mxu1 }
 0x690   :  { %v1769_v53 = vadd.f32 %v1704_v35, %v5559_v49  ;;  %v1771_v54 = vadd.f32 %v1755_v36, %v5561_v50  ;;  %v1706_v55 = vpop.f32.mrb[26].mxu0  ;;  %v1757_v57 = vpop.f32.mrb[34].mxu1  ;;  %v1813_v46 = vsel %vm1789_vm6, %v1765_v14, %v1801_v18  ;;  %v1815_v51 = vsel %vm1791_vm7, %v1767_v15, %v1803_v19 }
 0x691   :  { %v1809_v52 = vsel %vm1785_vm14, %v1761_v59, %v1797_v6  ;;  %v1811_v63 = vsel %vm1787_vm15, %v1763_v60, %v1799_v13  ;;  %v1707_v61 = vpop.f32.mrb[27].mxu0  ;;  %v1758_v58 = vpop.f32.mrb[35].mxu1  ;;  %v1804_v11 = vmul.f32 0.2, %v1768_v33  ;;  %v1806_v12 = vmul.f32 0.2, %v1770_v34 }
 0x692   :  { %vm1793_vm8 = vcmp.gt.f32.partialorder %v1769_v53, 0.0  ;;  %v1805_v0 = vmul.f32 0.2, %v1769_v53  ;;  %vm1795_vm11 = vcmp.gt.f32.partialorder %v1771_v54, 0.0  ;;  %v1807_v2 = vmul.f32 0.2, %v1771_v54 }
 0x693   :  { %v1821_v62 = vpack.c.bf16 %v1813_v46, %v1809_v52  ;;  %v1823_v5 = vpack.c.bf16 %v1815_v51, %v1811_v63  ;;  %vm1792_vm12 = vcmp.gt.f32.partialorder %v1768_v33, 0.0  ;;  %vm1794_vm13 = vcmp.gt.f32.partialorder %v1770_v34, 0.0 }
 0x694   :  { %v1817_v7 = vsel %vm1793_vm8, %v1769_v53, %v1805_v0  ;;  %v1819_v10 = vsel %vm1795_vm11, %v1771_v54, %v1807_v2  ;;  %v1816_v59 = vsel %vm1792_vm12, %v1768_v33, %v1804_v11  ;;  %v1818_v60 = vsel %vm1794_vm13, %v1770_v34, %v1806_v12 }
 0x695   :  { %2116 = vmatprep.mubr.bf16.mxu0 %v1821_v62  ;;  %2164 = vmatprep.mubr.bf16.mxu1 %v1823_v5  ;;  %v1825_v14 = vpack.c.bf16 %v1817_v7, %v1817_v7  ;;  %v1827_v15 = vpack.c.bf16 %v1819_v10, %v1819_v10  ;;  %v1824_v6 = vpack.c.bf16 %v1816_v59, %v1816_v59  ;;  %vm3401_vm11 = vcmask 31744  }
 0x696   :  { %2117 = vmatmul.mubr.bf16.vlgmr.msra.gmra.mrb[36].mxu0 %v1820_v31  ;;  %2165 = vmatmul.mubr.bf16.vlgmr.msra.gmra.mrb[44].mxu1 %v1822_v32  ;;  %v1826_v13 = vpack.c.bf16 %v1818_v60, %v1818_v60  ;;  %v5590_v17 = vcombine.high %v2245_v16, %v2245_v16  ;;  %v4359_v18 = vcombine.low %v2245_v16, %v2245_v16 }
 0x697   :  { %2124 = vmatprep.mubr.bf16.mxu0 %v1825_v14  ;;  %2172 = vmatprep.mubr.bf16.mxu1 %v1827_v15 }
 0x698   :  { %4363 = vmatprep.subr.msk.bf16.mxu1 %vm301_vm5, %v5590_v17  ;;  %v5595_v19 = vsel %vm301_vm5, %v4359_v18, 0 }
 0x699   :  { %2275 = vmatpush1.bf16.msra.mxu1 %v5595_v19 }
 0x69e   :  { %2125 = vmatmul.mubr.bf16.gmra.mrb[40].mxu0 %v1824_v6  ;;  %2173 = vmatmul.mubr.bf16.gmra.mrb[48].mxu1 %v1826_v13 }
 0x69f   :  { %2306 = vmatprep.mubr.bf16.mxu1 %v5167_v4  ;;  %4707 = vmatprep.mubr.msk.bf16.mxu0 %vm5176_vm9, %v5175_v8 }
 0x769   :  { %v4534_v20 = vpop.f32.mrb[36].mxu0  ;;  %v4562_v23 = vpop.f32.mrb[44].mxu1 }
 0x76a   :  { %v4535_v24 = vpop.f32.mrb[37].mxu0  ;;  %v4563_v25 = vpop.f32.mrb[45].mxu1 }
 0x76b   :  { %v4536_v28 = vadd.f32 %v4535_v24, %v4534_v20  ;;  %v4564_v30 = vadd.f32 %v4563_v25, %v4562_v23  ;;  %v4537_v31 = vpop.f32.mrb[38].mxu0  ;;  %v4565_v32 = vpop.f32.mrb[46].mxu1 }
 0x76c   :  { %v4538_v33 = vpop.f32.mrb[39].mxu0  ;;  %v4566_v34 = vpop.f32.mrb[47].mxu1 }
 0x76d   :  { %v2167_v35 = vadd.f32 %v4564_v30, %v4536_v28  ;;  %v4539_v36 = vadd.f32 %v4538_v33, %v4537_v31  ;;  %v4567_v53 = vadd.f32 %v4566_v34, %v4565_v32  ;;  %v2246_v33 = vld [vmem:[%s5587_s3 + $0x8] sm:$0xff] }
 0x76f   :  { %v2170_v54 = vadd.f32 %v4567_v53, %v4539_v36  ;;  %v2180_v55 = vsel %vm294_vm4, %v2167_v35, -inf  ;;  %v4361_v36 = vcombine.low %v2246_v33, %v2246_v33 }
 0x771   :  { %v2181_v57 = vsel %vm294_vm4, %v2170_v54, -inf  ;;  %v4540_v46 = vpop.f32.mrb[40].mxu0  ;;  %v4568_v51 = vpop.f32.mrb[48].mxu1 }
 0x772   :  { %v2183_v52 = vmax.f32 %v2180_v55, %v2181_v57  ;;  %v4541_v63 = vpop.f32.mrb[41].mxu0  ;;  %v4569_v0 = vpop.f32.mrb[49].mxu1 }
 0x773   :  { %v4542_v2 = vadd.f32 %v4541_v63, %v4540_v46  ;;  %v4570_v61 = vadd.f32 %v4569_v0, %v4568_v51  ;;  %v4543_v58 = vpop.f32.mrb[42].mxu0  ;;  %v4571_v62 = vpop.f32.mrb[50].mxu1 }
 0x774   :  { %v4544_v5 = vpop.f32.mrb[43].mxu0  ;;  %v4572_v7 = vpop.f32.mrb[51].mxu1 }
 0x775   :  { %v2175_v10 = vadd.f32 %v4570_v61, %v4542_v2 }
 0x777   :  { %v2182_v11 = vsel %vm294_vm4, %v2175_v10, -inf }
 0x778   :  { %v2184_v12 = vmax.f32 %v2183_v52, %v2182_v11 }
 0x77a   :  { %v2185_v14 = vrot.slane %v2184_v12, 4 }
 0x77c   :  { %v2186_v15 = vmax.f32 %v2184_v12, %v2185_v14 }
 0x77e   :  { %v2187_v59 = vrot.slane %v2186_v15, 2 }
 0x780   :  { %v2188_v60 = vmax.f32 %v2186_v15, %v2187_v59 }
 0x782   :  { %v2189_v6 = vrot.slane %v2188_v60, 1 }
 0x784   :  { %v2190_v13 = vmax.f32 %v2188_v60, %v2189_v6 }
 0x786   :  { %v2191_v16 = vsub.f32 %v2167_v35, %v2190_v13  ;;  %v2192_v18 = vsub.f32 %v2170_v54, %v2190_v13  ;;  %v2193_v20 = vsub.f32 %v2175_v10, %v2190_v13  ;;  %v5605_v35 = vcombine.high %v2246_v33, %v2246_v33  ;;  %v4996_v13 = vld [vmem:[%s5626_s7 + $0x4] ss:$8 sps:$4 sm:$0xff]  }
 0x787   :  { %v5611_v54 = vsel %vm301_vm5, %v4361_v36, 0  ;;  %v4997_v36 = vld [vmem:[%s5626_s7 + $0x10] ss:$8 sps:$4 sm:$0xff]  }
 0x788   :  { %v2194_v23 = vmul.f32 1.442695, %v2191_v16  ;;  %v2196_v24 = vmul.f32 1.442695, %v2192_v18  ;;  %v2198_v25 = vmul.f32 1.442695, %v2193_v20 }
 0x78a   :  { %5116 = vpow2.f32 %v2194_v23 }
 0x78b   :  { %5118 = vpow2.f32 %v2196_v24 }
 0x78c   :  { %5120 = vpow2.f32 %v2198_v25  ;;  %v4994_v25 = vld [vmem:[%s5626_s7] ss:$8 sps:$4 sm:$0xff]  }
 0x794   :  { %v5117_v28 = vpop.eup %5116 }
 0x795   :  { %v5119_v30 = vpop.eup %5118 }
 0x796   :  { %v5121_v31 = vpop.eup %5120  ;;  %v2200_v32 = vpack.c.bf16 %v5119_v30, %v5117_v28 }
 0x797   :  { %v2201_v34 = vpack.c.bf16 %v5121_v31, %v5121_v31  ;;  %v4999_v31 = vld [vmem:[%s5626_s7 + $0x14] ss:$8 sps:$4 sm:$0xff]  }
 0x798   :  { %4704 = vmatpush3.bf16.msra.mxu0 %v2200_v32  ;;  %4364 = vmatmul.mubr.msk.bf16.vlgmr.msra.gmra.mrb[52].mxu1 %vm294_vm4, %v2200_v32 }
 0x799   :  { %4705 = vmatprep.subr.bf16.mxu0 %v5175_v8  ;;  %2316 = vmatprep.mubr.bf16.mxu1 %v5167_v4  ;;  %v2203_v53 = vsel %vm301_vm5, %v2201_v34, 0 }
 0x79c   :  { %4706 = vmatpush3.bf16.msra.mxu0 %v2203_v53 }
 0x79d   :  { %4366 = vmatprep.subr.msk.bf16.mxu0 %vm301_vm5, %v5605_v35 }
 0x79f   :  { %4708 = vmatmul.mubr.msk.bf16.vlgmr.msra.gmra.mrb[44].mxu0 %vm588_vm10, %v5308_v43 }
 0x7a0   :  { %4365 = vmatmul.mubr.msk.bf16.gmra.mrb[56].mxu1 %vm294_vm4, %v2201_v34  ;;  %2326 = vmatpush1.bf16.msra.mxu0 %v5611_v54 }
 0x7a1   :  { %2357 = vmatprep.mubr.bf16.mxu0 %v5167_v4  ;;  %2440 = vmatprep.mubr.bf16.mxu1 %v5167_v4 }
 0x7a7   :  { %4367 = vmatmul.mubr.msk.bf16.vlgmr.msra.gmra.mrb[48].mxu0 %vm294_vm4, %v2200_v32 }
 0x7a8   :  { %2367 = vmatprep.mubr.bf16.mxu0 %v5167_v4 }
 0x7af   :  { %4368 = vmatmul.mubr.msk.bf16.gmra.mrb[52].mxu0 %vm294_vm4, %v2201_v34 }
 0x7b0   :  { %2481 = vmatprep.mubr.bf16.mxu0 %v5167_v4 }
 0x86b   :  { %v2308_v55 = vpop.f32.mrb[52].mxu1 }
 0x86c   :  { %v2376_v57 = vmul.f32 %v2308_v55, %v5539_v37  ;;  %v2310_v46 = vpop.f32.mrb[53].mxu1  ;;  %v5005_v55 = vld [vmem:[%s5626_s7 + $0x34] ss:$8 sps:$4 sm:$0xff]  }
 0x86d   :  { %v2377_v51 = vmul.f32 %v2310_v46, %v5543_v42  ;;  %v2312_v52 = vpop.f32.mrb[54].mxu1  ;;  %v5006_v46 = vld [vmem:[%s5626_s7 + $0x40] ss:$8 sps:$4 sm:$0xff]  }
 0x86e   :  { %v2380_v63 = vmul.f32 %v2312_v52, %v5547_v40  ;;  %v2314_v0 = vpop.f32.mrb[55].mxu1  ;;  %v5014_v52 = vld [vmem:[%s5626_s7 + $0x64] ss:$8 sps:$4 sm:$0xff]  }
 0x86f   :  { %v2381_v2 = vmul.f32 %v2314_v0, %v5551_v44  ;;  %v5015_v0 = vld [vmem:[%s5626_s7 + $0x70] ss:$8 sps:$4 sm:$0xff]  }
 0x870   :  { %v2388_v61 = vpack.c.bf16 %v2380_v63, %v2376_v57  ;;  %v5003_v57 = vld [vmem:[%s5626_s7 + $0x30] ss:$8 sps:$4 sm:$0xff]   ;;  %v5017_v63 = vld [vmem:[%s5626_s7 + $0x74] ss:$8 sps:$4 sm:$0xff]  }
 0x871   :  { %v2389_v58 = vpack.c.bf16 %v2381_v2, %v2377_v51  ;;  %v5012_v51 = vld [vmem:[%s5626_s7 + $0x60] ss:$8 sps:$4 sm:$0xff]   ;;  %v5020_v2 = vld [vmem:[%s5626_s7 + $0x84] ss:$8 sps:$4 sm:$0xff]  }
 0x872   :  { %v2239_v62 = vpop.f32.mrb[44].mxu0 }
 0x873   :  { %v4709_v5 = vpop.f32.mrb[45].mxu0  ;;  %v2318_v7 = vpop.f32.mrb[56].mxu1  ;;  %2408 = vmatprep.subr.bf16.mxu1 %v2389_v58  ;;  %v5023_v58 = vld [vmem:[%s5626_s7 + $0x94] ss:$8 sps:$4 sm:$0xff]  }
 0x874   :  { %v2384_v10 = vmul.f32 %v2318_v7, %v5555_v47  ;;  %v2242_v11 = vpop.f32.mrb[46].mxu0  ;;  %v2320_v37 = vpop.f32.mrb[57].mxu1  ;;  %2409 = vmatpush1.bf16.msra.mxu1 %v2388_v61  ;;  %v5018_v61 = vld [vmem:[%s5626_s7 + $0x80] ss:$8 sps:$4 sm:$0xff]   ;;  %v5026_v7 = vld [vmem:[%s5626_s7 + $0xa4] ss:$8 sps:$4 sm:$0xff]  }
 0x875   :  { %v2385_v42 = vmul.f32 %v2320_v37, %v5559_v49  ;;  %v4710_v12 = vpop.f32.mrb[47].mxu0  ;;  %v2322_v14 = vpop.f32.mrb[58].mxu1  ;;  %v5024_v5 = vld [vmem:[%s5626_s7 + $0xa0] ss:$8 sps:$4 sm:$0xff]   ;;  %v5027_v11 = vld [vmem:[%s5626_s7 + $0xb0] ss:$8 sps:$4 sm:$0xff]  }
 0x876   :  { %v2392_v40 = vpack.c.bf16 %v2384_v10, %v2384_v10  ;;  %v2323_v15 = vpop.f32.mrb[59].mxu1  ;;  %v5029_v10 = vld [vmem:[%s5626_s7 + $0xb4] ss:$8 sps:$4 sm:$0xff]   ;;  %v5032_v37 = vld [vmem:[%s5626_s7 + $0xc4] ss:$8 sps:$4 sm:$0xff]  }
 0x877   :  { %v2393_v59 = vpack.c.bf16 %v2385_v42, %v2385_v42  ;;  %v5030_v42 = vld [vmem:[%s5626_s7 + $0xc0] ss:$8 sps:$4 sm:$0xff]   ;;  %v5035_v12 = vld [vmem:[%s5626_s7 + $0xd4] ss:$8 sps:$4 sm:$0xff]   ;;  %v5033_v14 = vld [vmem:[%s5626_s7 + $0xd0] ss:$8 sps:$4 sm:$0xff]  }
 0x878   :  { %v2397_v44 = vsel %vm301_vm5, %v2392_v40, 0  ;;  %v5036_v40 = vld [vmem:[%s5626_s7 + $0xe0] ss:$8 sps:$4 sm:$0xff]   ;;  %v5038_v15 = vld [vmem:[%s5626_s7 + $0xe4] ss:$8 sps:$4 sm:$0xff]  }
 0x879   :  { %4369 = vmatprep.subr.msk.bf16.mxu1 %vm301_vm5, %v2393_v59  ;;  %v5041_v59 = vld [vmem:[%s5626_s7 + $0xf4] ss:$8 sps:$4 sm:$0xff]  }
 0x87a   :  { %v2359_v60 = vpop.f32.mrb[48].mxu0  ;;  %2411 = vmatpush1.bf16.msra.mxu1 %v2397_v44  ;;  %v5039_v44 = vld [vmem:[%s5626_s7 + $0xf0] ss:$8 sps:$4 sm:$0xff]  }
 0x87b   :  { %v2378_v6 = vmul.f32 %v2359_v60, %v5541_v38  ;;  %v2361_v47 = vpop.f32.mrb[49].mxu0  ;;  %4373 = vmatprep.subr.msk.bf16.mxu1 %vm301_vm5, %v5590_v17  ;;  %v2240_v38 = vadd.f32 1e-16, %v2239_v62  ;;  %v5021_v62 = vld [vmem:[%s5626_s7 + $0x90] ss:$8 sps:$4 sm:$0xff]  }
 0x87c   :  { %v2379_v49 = vmul.f32 %v2361_v47, %v5545_v39  ;;  %v2363_v16 = vpop.f32.mrb[50].mxu0  ;;  %v5044_v60 = vld [vmem:[%s5626_s7 + $0x104] ss:$8 sps:$4 sm:$0xff]  }
 0x87d   :  { %v2382_v18 = vmul.f32 %v2363_v16, %v5549_v41  ;;  %v2365_v20 = vpop.f32.mrb[51].mxu0  ;;  %4370 = vmatmul.mubr.msk.bf16.vlgmr.msra.gmra.mrb[60].mxu1 %vm588_vm10, %v5308_v43  ;;  %v2490_v41 = vpack.c.bf16 %v2240_v38, %v2240_v38 }
 0x87e   :  { %v2383_v23 = vmul.f32 %v2365_v20, %v5553_v45  ;;  %2495 = vmatpush1.bf16.msra.mxu1 %v5595_v19  ;;  %2526 = vmatprep.mubr.bf16.mxu1 %v5167_v4 }
 0x87f   :  { %v2390_v17 = vpack.c.bf16 %v2382_v18, %v2378_v6  ;;  %3034 = vmatprep.subr.bf16.mxu1 %v4996_v13  ;;  %v3116_v6 = vld [vmem:[%s4207_s11] sm:$0x3] }
 0x880   :  { %v2391_v24 = vpack.c.bf16 %v2383_v23, %v2379_v49  ;;  %v3118_v47 = vand.u32 %v3116_v6, %v5224_v9 }
 0x882   :  { %v2369_v39 = vpop.f32.mrb[52].mxu0  ;;  %2449 = vmatprep.subr.bf16.mxu0 %v2391_v24  ;;  %v2584_v24 = vld [vmem:[%s4204_s15] sm:$0xf]  ;;  %s5196_s15 = smov 25  }
 0x883   :  { %v2386_v28 = vmul.f32 %v2369_v39, %v5557_v48  ;;  %v2371_v30 = vpop.f32.mrb[53].mxu0  ;;  %2450 = vmatpush1.bf16.msra.mxu0 %v2390_v17  ;;  %v5002_v48 = vld [vmem:[%s5626_s7 + $0x24] ss:$8 sps:$4 sm:$0xff]   ;;  %s4214_s18 = sld [smem:[%s5922_s0 + %s5196_s15]]  }
 0x884   :  { %v2387_v45 = vmul.f32 %v2371_v30, %v5561_v50  ;;  %v2373_v19 = vpop.f32.mrb[54].mxu0  ;;  %v5000_v50 = vld [vmem:[%s5626_s7 + $0x20] ss:$8 sps:$4 sm:$0xff]  }
 0x885   :  { %v2394_v32 = vpack.c.bf16 %v2386_v28, %v2386_v28  ;;  %v2374_v33 = vpop.f32.mrb[55].mxu0  ;;  %4374 = vmatmul.mubr.msk.bf16.vlgmr.msra.gmra.mrb[64].mxu1 %vm294_vm4, %v2490_v41  ;;  %v2589_v28 = vrot.slane %v2584_v24, %v5262_v27 }
 0x886   :  { %v2395_v34 = vpack.c.bf16 %v2387_v45, %v2387_v45  ;;  %3035 = vmatpush1.bf16.msra.mxu1 %v4994_v25 }
 0x887   :  { %v2403_v53 = vsel %vm301_vm5, %v2394_v32, 0  ;;  %3036 = vmatprep.subr.bf16.mxu1 %v4999_v31  ;;  %v2593_v31 = vrot.slane %v2584_v24, %v5265_v29 }
 0x888   :  { %4371 = vmatprep.subr.msk.bf16.mxu0 %vm301_vm5, %v2395_v34 }
 0x889   :  { %2452 = vmatpush1.bf16.msra.mxu0 %v2403_v53 }
 0x88a   :  { %4375 = vmatprep.subr.msk.bf16.mxu0 %vm301_vm5, %v5605_v35  ;;  %3037 = vmatpush1.bf16.msra.mxu1 %v4997_v36  ;;  %v5008_v35 = vld [vmem:[%s5626_s7 + $0x44] ss:$8 sps:$4 sm:$0xff]  }
 0x88b   :  { %3038 = vmatprep.subr.bf16.mxu1 %v5002_v48 }
 0x88c   :  { %4372 = vmatmul.mubr.msk.bf16.vlgmr.msra.gmra.mrb[56].mxu0 %vm588_vm10, %v5308_v43 }
 0x88d   :  { %2536 = vmatpush1.bf16.msra.mxu0 %v5611_v54  ;;  %2567 = vmatprep.mubr.bf16.mxu0 %v5167_v4  ;;  %v5011_v54 = vld [vmem:[%s5626_s7 + $0x54] ss:$8 sps:$4 sm:$0xff]   ;;  %v5009_v4 = vld [vmem:[%s5626_s7 + $0x50] ss:$8 sps:$4 sm:$0xff]  }
 0x88e   :  { %3039 = vmatpush1.bf16.msra.mxu1 %v5000_v50  ;;  %4711 = vmatprep.subr.bf16.mxu0 %v3118_v47 }
 0x88f   :  { %3040 = vmatprep.subr.bf16.mxu1 %v5005_v55 }
 0x892   :  { %3041 = vmatpush1.bf16.msra.mxu1 %v5003_v57 }
 0x893   :  { %3042 = vmatprep.subr.bf16.mxu1 %v5008_v35 }
 0x894   :  { %4376 = vmatmul.mubr.msk.bf16.vlgmr.msra.gmra.mrb[60].mxu0 %vm294_vm4, %v2490_v41 }
 0x895   :  { %4713 = vmatprep.mubr.msk.bf16.mxu0 %vm224_vm2, %v5228_v21  ;;  %4712 = vmatpush3.bf16.msra.mxu0 %v3118_v47  ;;  %v5056_v47 = vld [vmem:[%s5626_s7 + $0x144] ss:$8 sps:$4 sm:$0xff]  }
 0x896   :  { %3043 = vmatpush1.bf16.msra.mxu1 %v5006_v46 }
 0x897   :  { %3044 = vmatprep.subr.bf16.mxu1 %v5011_v54  ;;  %v2597_v54 = vrot.slane %v2584_v24, %v877_v1 }
 0x89a   :  { %3045 = vmatpush1.bf16.msra.mxu1 %v5009_v4 }
 0x89b   :  { %3046 = vmatprep.subr.bf16.mxu1 %v5014_v52 }
 0x89c   :  { %4714 = vmatmul.mubr.msk.bf16.vlgmr.msra.gmra.mrb[64].mxu0 %vm224_vm2, %v5230_v22 }
 0x89d   :  { %4719 = vmatprep.mubr.msk.bf16.mxu0 %vm294_vm4, %v5476_v26 }
 0x89e   :  { %3047 = vmatpush1.bf16.msra.mxu1 %v5012_v51  ;;  %v2601_v51 = vrot.slane %v2584_v24, %v881_v56  ;;  %v5063_v24 = vld [vmem:[%s5626_s7 + $0x170] ss:$8 sps:$4 sm:$0xff]  }
 0x89f   :  { %3048 = vmatprep.subr.bf16.mxu1 %v5017_v63 }
 0x8a2   :  { %3049 = vmatpush1.bf16.msra.mxu1 %v5015_v0 }
 0x8a3   :  { %3050 = vmatprep.subr.bf16.mxu1 %v5020_v2 }
 0x8a6   :  { %3051 = vmatpush1.bf16.msra.mxu1 %v5018_v61 }
 0x8a7   :  { %3052 = vmatprep.subr.bf16.mxu1 %v5023_v58 }
 0x8aa   :  { %3053 = vmatpush1.bf16.msra.mxu1 %v5021_v62 }
 0x8ab   :  { %3054 = vmatprep.subr.bf16.mxu1 %v5026_v7 }
 0x8ae   :  { %3055 = vmatpush1.bf16.msra.mxu1 %v5024_v5 }
 0x8af   :  { %3056 = vmatprep.subr.bf16.mxu1 %v5029_v10 }
 0x8b2   :  { %3057 = vmatpush1.bf16.msra.mxu1 %v5027_v11 }
 0x8b3   :  { %3058 = vmatprep.subr.bf16.mxu1 %v5032_v37  ;;  %v5042_v37 = vld [vmem:[%s5626_s7 + $0x100] ss:$8 sps:$4 sm:$0xff]  }
 0x8b6   :  { %3059 = vmatpush1.bf16.msra.mxu1 %v5030_v42 }
 0x8b7   :  { %3060 = vmatprep.subr.bf16.mxu1 %v5035_v12  ;;  %v5047_v12 = vld [vmem:[%s5626_s7 + $0x114] ss:$8 sps:$4 sm:$0xff]  }
 0x8ba   :  { %3061 = vmatpush1.bf16.msra.mxu1 %v5033_v14  ;;  %v5045_v14 = vld [vmem:[%s5626_s7 + $0x110] ss:$8 sps:$4 sm:$0xff]  }
 0x8bb   :  { %3062 = vmatprep.subr.bf16.mxu1 %v5038_v15  ;;  %v5048_v15 = vld [vmem:[%s5626_s7 + $0x120] ss:$8 sps:$4 sm:$0xff]  }
 0x8be   :  { %3063 = vmatpush1.bf16.msra.mxu1 %v5036_v40  ;;  %v5050_v40 = vld [vmem:[%s5626_s7 + $0x124] ss:$8 sps:$4 sm:$0xff]  }
 0x8bf   :  { %3064 = vmatprep.subr.bf16.mxu1 %v5041_v59  ;;  %v5053_v59 = vld [vmem:[%s5626_s7 + $0x134] ss:$8 sps:$4 sm:$0xff]  }
 0x8c2   :  { %3065 = vmatpush1.bf16.msra.mxu1 %v5039_v44 }
 0x8c3   :  { %3075 = vmatprep.subr.bf16.mxu1 %v5044_v60  ;;  %v5051_v60 = vld [vmem:[%s5626_s7 + $0x130] ss:$8 sps:$4 sm:$0xff]  }
 0x950   :  { %v2442_v13 = vpop.f32.mrb[60].mxu1 }
 0x951   :  { %v2444_v49 = vpop.f32.mrb[61].mxu1 }
 0x952   :  { %v2446_v16 = vpop.f32.mrb[62].mxu1 }
 0x953   :  { %v2447_v18 = vpop.f32.mrb[63].mxu1  ;;  %v5054_v16 = vld [vmem:[%s5626_s7 + $0x140] ss:$8 sps:$4 sm:$0xff]  }
 0x954   :  { %v5059_v18 = vld [vmem:[%s5626_s7 + $0x154] ss:$8 sps:$4 sm:$0xff]  }
 0x958   :  { %v2528_v20 = vpop.f32.mrb[64].mxu1 }
 0x959   :  { %5122 = vrcp.f32 %v2528_v20  ;;  %v2530_v23 = vpop.f32.mrb[65].mxu1  ;;  %v5057_v20 = vld [vmem:[%s5626_s7 + $0x150] ss:$8 sps:$4 sm:$0xff]  }
 0x95a   :  { %5124 = vrcp.f32 %v2530_v23  ;;  %v2532_v38 = vpop.f32.mrb[66].mxu1  ;;  %v5062_v23 = vld [vmem:[%s5626_s7 + $0x164] ss:$8 sps:$4 sm:$0xff]  }
 0x95b   :  { %v2533_v17 = vpop.f32.mrb[67].mxu1  ;;  %v5060_v38 = vld [vmem:[%s5626_s7 + $0x160] ss:$8 sps:$4 sm:$0xff]  }
 0x95c   :  { %v5065_v17 = vld [vmem:[%s5626_s7 + $0x174] ss:$8 sps:$4 sm:$0xff]  }
 0x95f   :  { %v2483_v39 = vpop.f32.mrb[56].mxu0 }
 0x960   :  { %v2485_v25 = vpop.f32.mrb[57].mxu0 }
 0x961   :  { %v2487_v41 = vpop.f32.mrb[58].mxu0 }
 0x962   :  { %v2488_v26 = vpop.f32.mrb[59].mxu0  ;;  %v5071_v41 = vld [vmem:[%s5626_s7 + $0x194] ss:$8 sps:$4 sm:$0xff]  }
 0x963   :  { %v5123_v30 = vpop.eup %5122  ;;  %v5069_v26 = vld [vmem:[%s5626_s7 + $0x190] ss:$8 sps:$4 sm:$0xff]  }
 0x964   :  { %v5125_v45 = vpop.eup %5124  ;;  %v2577_v19 = vmul.f32 %v5123_v30, %v2442_v13 }
 0x965   :  { %v2579_v32 = vmul.f32 %v5125_v45, %v2444_v49  ;;  %v5077_v45 = vld [vmem:[%s5626_s7 + $0x1b4] ss:$8 sps:$4 sm:$0xff]  }
 0x966   :  { %v2606_v33 = vadd.f32 %v2589_v28, %v2577_v19  ;;  %v5074_v28 = vld [vmem:[%s5626_s7 + $0x1a4] ss:$8 sps:$4 sm:$0xff]  }
 0x967   :  { %v2569_v34 = vpop.f32.mrb[60].mxu0  ;;  %v2607_v36 = vadd.f32 %v2593_v31, %v2579_v32  ;;  %v5072_v31 = vld [vmem:[%s5626_s7 + $0x1a0] ss:$8 sps:$4 sm:$0xff]   ;;  %v5075_v32 = vld [vmem:[%s5626_s7 + $0x1b0] ss:$8 sps:$4 sm:$0xff]  }
 0x968   :  { %5126 = vrcp.f32 %v2569_v34  ;;  %v2571_v53 = vpop.f32.mrb[61].mxu0  ;;  %v2614_v48 = vmin.f32 %v2606_v33, 0.0  ;;  %vm2610_vm14 = vcmp.gt.f32.partialorder %v2606_v33, 0.0  ;;  %v5078_v34 = vld [vmem:[%s5626_s7 + $0x1c0] ss:$8 sps:$4 sm:$0xff]  }
 0x969   :  { %5128 = vrcp.f32 %v2571_v53  ;;  %v2573_v50 = vpop.f32.mrb[62].mxu0  ;;  %v2615_v55 = vmin.f32 %v2607_v36, 0.0  ;;  %vm2611_vm15 = vcmp.gt.f32.partialorder %v2607_v36, 0.0  ;;  %v5081_v53 = vld [vmem:[%s5626_s7 + $0x1d0] ss:$8 sps:$4 sm:$0xff]  }
 0x96a   :  { %v2574_v57 = vpop.f32.mrb[63].mxu0  ;;  %v2618_v35 = vmul.f32 1.442695, %v2614_v48  ;;  %v5086_v48 = vld [vmem:[%s5626_s7 + $0x1e4] ss:$8 sps:$4 sm:$0xff]  }
 0x96b   :  { %v2620_v46 = vmul.f32 1.442695, %v2615_v55  ;;  %v5084_v55 = vld [vmem:[%s5626_s7 + $0x1e0] ss:$8 sps:$4 sm:$0xff]   ;;  %v5089_v57 = vld [vmem:[%s5626_s7 + $0x1f4] ss:$8 sps:$4 sm:$0xff]  }
 0x96c   :  { %5130 = vpow2.f32 %v2618_v35 }
 0x96d   :  { %5132 = vpow2.f32 %v2620_v46  ;;  %v5087_v46 = vld [vmem:[%s5626_s7 + $0x1f0] ss:$8 sps:$4 sm:$0xff]  }
 0x972   :  { %v5127_v4 = vpop.eup %5126 }
 0x973   :  { %v5129_v52 = vpop.eup %5128  ;;  %v2581_v63 = vmul.f32 %v5127_v4, %v2483_v39  ;;  %v5068_v39 = vld [vmem:[%s5626_s7 + $0x184] ss:$8 sps:$4 sm:$0xff]  }
 0x974   :  { %v2583_v0 = vmul.f32 %v5129_v52, %v2485_v25  ;;  %v5066_v25 = vld [vmem:[%s5626_s7 + $0x180] ss:$8 sps:$4 sm:$0xff]  }
 0x975   :  { %v5710_v2 = vadd.f32 %v2597_v54, %v2581_v63  ;;  %v2702_v52 = vld [vmem:[%s4206_s24] sm:$0x3]  ;;  %s5198_s24 = smov 28  }
 0x976   :  { %v5131_v61 = vpop.eup %5130  ;;  %v2609_v58 = vadd.f32 %v2601_v51, %v2583_v0  ;;  %v5161_v51 = vld [vmem:[%s5240_s21] sm:$0xff]   ;;  %v2707_v63 = vrot.slane %v2702_v52, %v5262_v27  ;;  %v2711_v0 = vrot.slane %v2702_v52, %v5265_v29  ;;  %s4216_s26 = sld [smem:[%s5922_s0 + %s5198_s24]]  }
 0x977   :  { %v5133_v62 = vpop.eup %5132  ;;  %v4377_v5 = vadd.f32 -1.0, %v5131_v61  ;;  %v2616_v30 = vmin.f32 %v5710_v2, 0.0  ;;  %vm2612_vm3 = vcmp.gt.f32.partialorder %v5710_v2, 0.0  ;;  %v5090_v27 = vld [vmem:[%s5751_s19] sm:$0xff]  }
 0x978   :  { %v4378_v7 = vadd.f32 -1.0, %v5133_v62  ;;  %v2617_v1 = vmin.f32 %v2609_v58, 0.0  ;;  %vm2613_vm0 = vcmp.gt.f32.partialorder %v2609_v58, 0.0 }
 0x979   :  { %v2630_v3 = vsel %vm2610_vm14, %v2606_v33, %v4377_v5  ;;  %v2622_v19 = vmul.f32 1.442695, %v2616_v30  ;;  %v5080_v33 = vld [vmem:[%s5626_s7 + $0x1c4] ss:$8 sps:$4 sm:$0xff]   ;;  %vm3977_vm14 = vcmask 7168  }
 0x97a   :  { %v2631_v56 = vsel %vm2611_vm15, %v2607_v36, %v4378_v7  ;;  %v2624_v10 = vmul.f32 1.442695, %v2617_v1  ;;  %v2634_v42 = vpack.c.bf16 %v2630_v3, %v2630_v3  ;;  %v5083_v36 = vld [vmem:[%s5626_s7 + $0x1d4] ss:$8 sps:$4 sm:$0xff]  }
 0x97b   :  { %v2635_v11 = vpack.c.bf16 %v2631_v56, %v2631_v56 }
 0x97c   :  { %5134 = vpow2.f32 %v2624_v10  ;;  %v5764_v10 = vld [vmem:[%s5240_s21 + $0x8] ss:$0 sps:$4 sm:$0xff]   ;;  %s5190_s21 = smov 20  }
 0x97d   :  { %3066 = vmatprep.mubr.bf16.mxu1 %v2635_v11  ;;  %5136 = vpow2.f32 %v2622_v19  ;;  %v5769_v11 = vld [vmem:[%s5245_s25] sm:$0xff]   ;;  %s4209_s27 = sld [smem:[%s5922_s0 + %s5190_s21]]  }
 0x97e   :  { %3067 = vmatmul.mubr.bf16.vlgmr.msra.gmra.mrb[68].mxu1 %v2634_v42  ;;  %v5775_v42 = vld [vmem:[%s5245_s25 + $0x8] ss:$0 sps:$4 sm:$0xff]  }
 0x97f   :  { %3076 = vmatpush1.bf16.msra.mxu1 %v5042_v37  ;;  %v5091_v37 = vld [vmem:[%s5751_s19 + $0x8] sm:$0xff]  }
 0x980   :  { %3077 = vmatprep.subr.bf16.mxu1 %v5047_v12  ;;  %v5092_v12 = vld [vmem:[%s5751_s19 + $0x10] sm:$0xff]  }
 0x983   :  { %3078 = vmatpush1.bf16.msra.mxu1 %v5045_v14  ;;  %v5093_v14 = vld [vmem:[%s5751_s19 + $0x18] sm:$0xff]  }
 0x984   :  { %3079 = vmatprep.subr.bf16.mxu1 %v5050_v40  ;;  %v5094_v40 = vld [vmem:[%s5751_s19 + $0x20] sm:$0xff]  }
 0x986   :  { %v5135_v44 = vpop.eup %5134 }
 0x987   :  { %3080 = vmatpush1.bf16.msra.mxu1 %v5048_v15  ;;  %v4380_v6 = vadd.f32 -1.0, %v5135_v44  ;;  %v5137_v50 = vpop.eup %5136  ;;  %v5095_v15 = vld [vmem:[%s5751_s19 + $0x28] sm:$0xff]   ;;  %v5097_v44 = vld [vmem:[%s5751_s19 + $0x38] sm:$0xff]  }
 0x988   :  { %3081 = vmatprep.subr.bf16.mxu1 %v5053_v59  ;;  %v4379_v35 = vadd.f32 -1.0, %v5137_v50  ;;  %v5096_v59 = vld [vmem:[%s5751_s19 + $0x30] sm:$0xff]   ;;  %s5197_s19 = smov 27  }
 0x989   :  { %v2633_v13 = vsel %vm2613_vm0, %v2609_v58, %v4380_v6  ;;  %s4215_s23 = sld [smem:[%s5922_s0 + %s5197_s19]]  }
 0x98a   :  { %v2637_v49 = vpack.c.bf16 %v2633_v13, %v2633_v13  ;;  %v2632_v54 = vsel %vm2612_vm3, %v5710_v2, %v4379_v35 }
 0x98b   :  { %3082 = vmatpush1.bf16.msra.mxu1 %v5051_v60  ;;  %v2636_v4 = vpack.c.bf16 %v2632_v54, %v2632_v54 }
 0x98c   :  { %3107 = vmatprep.mubr.bf16.mxu1 %v2637_v49  ;;  %3083 = vmatprep.subr.bf16.mxu1 %v5056_v47 }
 0x98f   :  { %3084 = vmatpush1.bf16.msra.mxu1 %v5054_v16 }
 0x990   :  { %3085 = vmatprep.subr.bf16.mxu1 %v5059_v18 }
 0x993   :  { %3086 = vmatpush1.bf16.msra.mxu1 %v5057_v20 }
 0x994   :  { %3087 = vmatprep.subr.bf16.mxu1 %v5062_v23 }
 0x997   :  { %3088 = vmatpush1.bf16.msra.mxu1 %v5060_v38 }
 0x998   :  { %3089 = vmatprep.subr.bf16.mxu1 %v5065_v17 }
 0x99b   :  { %3090 = vmatpush1.bf16.msra.mxu1 %v5063_v24 }
 0x99c   :  { %3091 = vmatprep.subr.bf16.mxu1 %v5068_v39 }
 0x99f   :  { %3092 = vmatpush1.bf16.msra.mxu1 %v5066_v25 }
 0x9a0   :  { %3093 = vmatprep.subr.bf16.mxu1 %v5071_v41 }
 0x9a3   :  { %3094 = vmatpush1.bf16.msra.mxu1 %v5069_v26 }
 0x9a4   :  { %3095 = vmatprep.subr.bf16.mxu1 %v5074_v28 }
 0x9a7   :  { %3096 = vmatpush1.bf16.msra.mxu1 %v5072_v31 }
 0x9a8   :  { %3097 = vmatprep.subr.bf16.mxu1 %v5077_v45 }
 0x9ab   :  { %3098 = vmatpush1.bf16.msra.mxu1 %v5075_v32 }
 0x9ac   :  { %3099 = vmatprep.subr.bf16.mxu1 %v5080_v33 }
 0x9af   :  { %3100 = vmatpush1.bf16.msra.mxu1 %v5078_v34 }
 0x9b0   :  { %3101 = vmatprep.subr.bf16.mxu1 %v5083_v36 }
 0x9b3   :  { %3102 = vmatpush1.bf16.msra.mxu1 %v5081_v53 }
 0x9b4   :  { %3103 = vmatprep.subr.bf16.mxu1 %v5086_v48 }
 0x9b7   :  { %3104 = vmatpush1.bf16.msra.mxu1 %v5084_v55 }
 0x9b8   :  { %3105 = vmatprep.subr.bf16.mxu1 %v5089_v57 }
 0x9bb   :  { %3106 = vmatpush1.bf16.msra.mxu1 %v5087_v46 }
 0x9be   :  { %3108 = vmatmul.mubr.bf16.vlgmr.msra.gmra.mrb[68].mxu1 %v2636_v4 }
 0x9bf   :  { %4805 = vmatprep.mubr.msk.bf16.mxu1 %vm294_vm4, %v5161_v51 }
 0xa91   :  { %v3109_v2 = vpop.f32.mrb[68].mxu1 }
 0xa92   :  { %v4858_v61 = vadd.f32 %v3109_v2, %v2707_v63  ;;  %v3111_v58 = vpop.f32.mrb[69].mxu1 }
 0xa93   :  { %v4859_v62 = vadd.f32 %v3111_v58, %v2711_v0  ;;  %v3113_v5 = vpop.f32.mrb[70].mxu1 }
 0xa94   :  { %v3168_v7 = vpack.c.bf16 %v4858_v61, %v4858_v61  ;;  %v3114_v1 = vpop.f32.mrb[71].mxu1 }
 0xa95   :  { %v3220_v3 = vpack.c.bf16 %v4859_v62, %v4859_v62 }
 0xa96   :  { %v3170_v56 = vsel %vm301_vm5, %v3168_v7, 0  ;;  %4901 = vmatprep.subr.msk.bf16.mxu0 %vm301_vm5, %v3168_v7 }
 0xa97   :  { %4718 = vmatpush3.bf16.msra.mxu0 %v3170_v56  ;;  %v3222_v29 = vsel %vm301_vm5, %v3220_v3, 0 }
 0xa98   :  { %4902 = vmatprep.subr.msk.bf16.mxu0 %vm301_vm5, %v3220_v3  ;;  %v3467_v3 = vld [vmem:[%s4209_s27] sm:$0x3]  ;;  %s5199_s27 = smov 29  }
 0xa99   :  { %s4217_s30 = sld [smem:[%s5922_s0 + %s5199_s27]]  }
 0xa9a   :  { %4720 = vmatmul.mubr.msk.bf16.vlgmr.msra.gmra.mrb[68].mxu0 %vm294_vm4, %v5764_v10 }
 0xa9b   :  { %4724 = vmatpush3.bf16.msra.mxu0 %v3222_v29  ;;  %4725 = vmatprep.mubr.msk.bf16.mxu0 %vm294_vm4, %v5769_v11 }
 0xa9c   :  { %4729 = vmatprep.subr.bf16.mxu0 %v5090_v27 }
 0xaa2   :  { %4726 = vmatmul.mubr.msk.bf16.vlgmr.msra.gmra.mrb[64].mxu0 %vm294_vm4, %v5775_v42 }
 0xaa3   :  { %4730 = vmatpush3.bf16.msra.mxu0 %v5090_v27  ;;  %v3474_v27 = vsel %vm231_vm1, %v3467_v3, 0 }
 0xaa4   :  { %4731 = vmatprep.subr.bf16.mxu0 %v5091_v37 }
 0xaa7   :  { %4732 = vmatpush3.bf16.msra.mxu0 %v5091_v37 }
 0xaa8   :  { %4733 = vmatprep.subr.bf16.mxu0 %v5092_v12 }
 0xaab   :  { %4734 = vmatpush3.bf16.msra.mxu0 %v5092_v12 }
 0xaac   :  { %4735 = vmatprep.subr.bf16.mxu0 %v5093_v14 }
 0xaaf   :  { %4736 = vmatpush3.bf16.msra.mxu0 %v5093_v14 }
 0xab0   :  { %4737 = vmatprep.subr.bf16.mxu0 %v5094_v40 }
 0xab3   :  { %4738 = vmatpush3.bf16.msra.mxu0 %v5094_v40 }
 0xab4   :  { %4739 = vmatprep.subr.bf16.mxu0 %v5095_v15 }
 0xab7   :  { %4740 = vmatpush3.bf16.msra.mxu0 %v5095_v15 }
 0xab8   :  { %4741 = vmatprep.subr.bf16.mxu0 %v5096_v59 }
 0xabb   :  { %4742 = vmatpush3.bf16.msra.mxu0 %v5096_v59 }
 0xabc   :  { %4743 = vmatprep.subr.bf16.mxu0 %v5097_v44 }
 0xabf   :  { %4744 = vmatpush3.bf16.msra.mxu0 %v5097_v44 }
 0xac0   :  { %4749 = vmatprep.subr.bf16.mxu0 %v5175_v8 }
 0xb6d   :  { %v5786_v60 = vpop.f32.mrb[68].mxu0 }
 0xb6e   :  { %v5788_v6 = vpop.f32.mrb[69].mxu0 }
 0xb6f   :  { %v4722_v47 = vpop.f32.mrb[70].mxu0 }
 0xb70   :  { %v5790_v13 = vpop.f32.mrb[71].mxu0 }
 0xb75   :  { %v4727_v49 = vpop.f32.mrb[64].mxu0 }
 0xb76   :  { %v3274_v16 = vadd.f32 %v4727_v49, %v5786_v60  ;;  %v3258_v18 = vpop.f32.mrb[65].mxu0 }
 0xb77   :  { %v3272_v20 = vadd.f32 %v3258_v18, %v5788_v6  ;;  %v4728_v23 = vpop.f32.mrb[66].mxu0 }
 0xb78   :  { %v3283_v38 = vmul.f32 0.2, %v3274_v16  ;;  %v3261_v17 = vpop.f32.mrb[67].mxu0  ;;  %vm3280_vm6 = vcmp.gt.f32.partialorder %v3274_v16, 0.0 }
 0xb79   :  { %v3281_v24 = vmul.f32 0.2, %v3272_v20  ;;  %v3273_v39 = vadd.f32 %v3261_v17, %v5790_v13  ;;  %vm3278_vm7 = vcmp.gt.f32.partialorder %v3272_v20, 0.0  ;;  %v5100_v17 = vld [vmem:[%s4211_s1 + $0x10] sm:$0xff]  }
 0xb7a   :  { %v3286_v41 = vsel %vm3280_vm6, %v3274_v16, %v3283_v38  ;;  %v5099_v38 = vld [vmem:[%s4211_s1 + $0x8] sm:$0xff]  }
 0xb7b   :  { %vm3279_vm8 = vcmp.gt.f32.partialorder %v3273_v39, 0.0  ;;  %v3282_v25 = vmul.f32 0.2, %v3273_v39  ;;  %v3284_v26 = vsel %vm3278_vm7, %v3272_v20, %v3281_v24  ;;  %v3288_v31 = vpack.c.bf16 %v3286_v41, %v3286_v41  ;;  %v5101_v24 = vld [vmem:[%s4211_s1 + $0x18] sm:$0xff]   ;;  %v5104_v41 = vld [vmem:[%s4211_s1 + $0x30] sm:$0xff]  }
 0xb7d   :  { %v3285_v28 = vsel %vm3279_vm8, %v3273_v39, %v3282_v25  ;;  %v5102_v39 = vld [vmem:[%s4211_s1 + $0x20] sm:$0xff]   ;;  %v5103_v25 = vld [vmem:[%s4211_s1 + $0x28] sm:$0xff]  }
 0xb7e   :  { %v3287_v30 = vpack.c.bf16 %v3285_v28, %v3284_v26  ;;  %v5105_v26 = vld [vmem:[%s4211_s1 + $0x38] sm:$0xff]  }
 0xb80   :  { %4745 = vmatprep.mubr.bf16.mxu0 %v3287_v30 }
 0xb81   :  { %4746 = vmatmul.mubr.bf16.vlgmr.msra.gmra.mrb[72].mxu0 %v3288_v31 }
 0xb82   :  { %4753 = vmatprep.mubr.msk.bf16.mxu0 %vm5176_vm9, %v5175_v8 }
 0xc54   :  { %v4747_v45 = vpop.f32.mrb[72].mxu0 }
 0xc55   :  { %v3387_v19 = vpop.f32.mrb[73].mxu0  ;;  %v3404_v48 = vsel %vm3401_vm11, %v4747_v45, -inf }
 0xc56   :  { %v4748_v32 = vpop.f32.mrb[74].mxu0  ;;  %v3402_v34 = vsel %vm3401_vm11, %v3387_v19, -inf }
 0xc57   :  { %v3390_v33 = vpop.f32.mrb[75].mxu0 }
 0xc58   :  { %v3403_v36 = vsel %vm3401_vm11, %v3390_v33, -inf }
 0xc59   :  { %v3405_v53 = vmax.f32 %v3402_v34, %v3403_v36 }
 0xc5b   :  { %v3406_v50 = vmax.f32 %v3405_v53, %v3404_v48  ;;  %v4464_v53 = vld [vmem:[%s4210_s5] ss:$0 sm:$0xff] }
 0xc5d   :  { %v3407_v55 = vrot.slane %v3406_v50, 4 }
 0xc5f   :  { %v3408_v57 = vmax.f32 %v3406_v50, %v3407_v55 }
 0xc61   :  { %v3409_v35 = vrot.slane %v3408_v57, 2 }
 0xc63   :  { %v3410_v46 = vmax.f32 %v3408_v57, %v3409_v35 }
 0xc65   :  { %v3411_v54 = vrot.slane %v3410_v46, 1 }
 0xc67   :  { %v3412_v4 = vmax.f32 %v3410_v46, %v3411_v54 }
 0xc69   :  { %v3413_v51 = vsub.f32 %v3387_v19, %v3412_v4  ;;  %v3414_v52 = vsub.f32 %v3390_v33, %v3412_v4  ;;  %v3415_v63 = vsub.f32 %v4747_v45, %v3412_v4 }
 0xc6b   :  { %v3416_v0 = vmul.f32 1.442695, %v3413_v51  ;;  %v3418_v2 = vmul.f32 1.442695, %v3414_v52  ;;  %v3420_v61 = vmul.f32 1.442695, %v3415_v63 }
 0xc6c   :  { %v3744_v51 = vld [vmem:[%s4213_s9] sm:$0x3] }
 0xc6d   :  { %5138 = vpow2.f32 %v3416_v0  ;;  %v3746_v52 = vand.u32 %v3744_v51, %v5224_v9 }
 0xc6e   :  { %5140 = vpow2.f32 %v3418_v2 }
 0xc6f   :  { %5142 = vpow2.f32 %v3420_v61 }
 0xc77   :  { %v5139_v58 = vpop.eup %5138 }
 0xc78   :  { %v5141_v62 = vpop.eup %5140 }
 0xc79   :  { %v5143_v5 = vpop.eup %5142  ;;  %v3422_v7 = vpack.c.bf16 %v5141_v62, %v5139_v58 }
 0xc7a   :  { %v3423_v1 = vpack.c.bf16 %v5143_v5, %v5143_v5 }
 0xc7b   :  { %4750 = vmatpush3.bf16.msra.mxu0 %v3422_v7 }
 0xc7c   :  { %4751 = vmatprep.subr.bf16.mxu0 %v5175_v8  ;;  %v3425_v56 = vsel %vm301_vm5, %v3423_v1, 0 }
 0xc7f   :  { %4752 = vmatpush3.bf16.msra.mxu0 %v3425_v56 }
 0xc80   :  { %4903 = vmatprep.subr.msk.bf16.mxu0 %vm231_vm1, %v3467_v3 }
 0xc82   :  { %4754 = vmatmul.mubr.msk.bf16.vlgmr.msra.gmra.mrb[76].mxu0 %vm588_vm10, %v5308_v43 }
 0xc83   :  { %4759 = vmatprep.mubr.msk.bf16.mxu0 %vm3401_vm11, %v3422_v7  ;;  %4758 = vmatpush3.bf16.msra.mxu0 %v3474_v27 }
 0xc84   :  { %4763 = vmatprep.subr.bf16.mxu0 %v5175_v8 }
 0xc8a   :  { %4760 = vmatmul.mubr.msk.bf16.vlgmr.msra.gmra.mrb[80].mxu0 %vm3401_vm11, %v3423_v1 }
 0xc8b   :  { %4767 = vmatprep.mubr.msk.bf16.mxu0 %vm5176_vm9, %v5175_v8 }
 0xd55   :  { %v3461_v29 = vpop.f32.mrb[76].mxu0 }
 0xd56   :  { %v4755_v37 = vpop.f32.mrb[77].mxu0 }
 0xd57   :  { %v3464_v12 = vpop.f32.mrb[78].mxu0 }
 0xd58   :  { %v4756_v14 = vpop.f32.mrb[79].mxu0 }
 0xd5d   :  { %v4761_v40 = vpop.f32.mrb[80].mxu0 }
 0xd5e   :  { %v3526_v15 = vmul.f32 %v4761_v40, %v5786_v60  ;;  %v3510_v59 = vpop.f32.mrb[81].mxu0  ;;  %v3462_v60 = vadd.f32 1e-16, %v3461_v29 }
 0xd5f   :  { %v3524_v44 = vmul.f32 %v3510_v59, %v5788_v6  ;;  %v4762_v47 = vpop.f32.mrb[82].mxu0 }
 0xd60   :  { %v3513_v49 = vpop.f32.mrb[83].mxu0  ;;  %v3528_v20 = vpack.c.bf16 %v3526_v15, %v3526_v15  ;;  %v3572_v6 = vpack.c.bf16 %v3462_v60, %v3462_v60 }
 0xd61   :  { %v3525_v16 = vmul.f32 %v3513_v49, %v5790_v13  ;;  %v5098_v13 = vld [vmem:[%s4211_s1] sm:$0xff]  }
 0xd62   :  { %v3530_v23 = vsel %vm301_vm5, %v3528_v20, 0 }
 0xd63   :  { %v3527_v18 = vpack.c.bf16 %v3525_v16, %v3524_v44 }
 0xd65   :  { %4764 = vmatpush3.bf16.msra.mxu0 %v3527_v18 }
 0xd66   :  { %4765 = vmatprep.subr.bf16.mxu0 %v5175_v8 }
 0xd69   :  { %4766 = vmatpush3.bf16.msra.mxu0 %v3530_v23 }
 0xd6a   :  { %4771 = vmatprep.subr.bf16.mxu0 %v5175_v8 }
 0xd6c   :  { %4768 = vmatmul.mubr.msk.bf16.vlgmr.msra.gmra.mrb[84].mxu0 %vm588_vm10, %v5308_v43 }
 0xd6d   :  { %4772 = vmatpush3.bf16.msra.mxu0 %v3474_v27  ;;  %4773 = vmatprep.mubr.msk.bf16.mxu0 %vm5176_vm9, %v5175_v8 }
 0xd6e   :  { %4777 = vmatprep.subr.bf16.mxu0 %v5175_v8 }
 0xd74   :  { %4774 = vmatmul.mubr.msk.bf16.vlgmr.msra.gmra.mrb[88].mxu0 %vm3401_vm11, %v3572_v6 }
 0xd75   :  { %4793 = vmatprep.mubr.msk.bf16.mxu0 %vm5176_vm9, %v5175_v8  ;;  %4778 = vmatpush3.bf16.msra.mxu0 %v5098_v13 }
 0xd76   :  { %4779 = vmatprep.subr.bf16.mxu0 %v5175_v8 }
 0xd79   :  { %4780 = vmatpush3.bf16.msra.mxu0 %v5099_v38 }
 0xd7a   :  { %4781 = vmatprep.subr.bf16.mxu0 %v5175_v8 }
 0xd7d   :  { %4782 = vmatpush3.bf16.msra.mxu0 %v5100_v17 }
 0xd7e   :  { %4783 = vmatprep.subr.bf16.mxu0 %v5175_v8 }
 0xd81   :  { %4784 = vmatpush3.bf16.msra.mxu0 %v5101_v24 }
 0xd82   :  { %4785 = vmatprep.subr.bf16.mxu0 %v5175_v8 }
 0xd85   :  { %4786 = vmatpush3.bf16.msra.mxu0 %v5102_v39 }
 0xd86   :  { %4787 = vmatprep.subr.bf16.mxu0 %v5175_v8 }
 0xd89   :  { %4788 = vmatpush3.bf16.msra.mxu0 %v5103_v25 }
 0xd8a   :  { %4789 = vmatprep.subr.bf16.mxu0 %v5175_v8 }
 0xd8d   :  { %4790 = vmatpush3.bf16.msra.mxu0 %v5104_v41 }
 0xd8e   :  { %4791 = vmatprep.subr.bf16.mxu0 %v5175_v8 }
 0xd91   :  { %4792 = vmatpush3.bf16.msra.mxu0 %v5105_v26 }
 0xd92   :  { %4797 = vmatprep.subr.bf16.mxu0 %v3746_v52 }
 0xe3f   :  { %v3566_v28 = vpop.f32.mrb[84].mxu0 }
 0xe40   :  { %v4769_v30 = vpop.f32.mrb[85].mxu0 }
 0xe41   :  { %v3569_v31 = vpop.f32.mrb[86].mxu0 }
 0xe42   :  { %v4770_v45 = vpop.f32.mrb[87].mxu0 }
 0xe47   :  { %v3610_v19 = vpop.f32.mrb[88].mxu0 }
 0xe48   :  { %5144 = vrcp.f32 %v3610_v19  ;;  %v4775_v32 = vpop.f32.mrb[89].mxu0 }
 0xe49   :  { %v3613_v33 = vpop.f32.mrb[90].mxu0 }
 0xe4a   :  { %v4776_v34 = vpop.f32.mrb[91].mxu0 }
 0xe52   :  { %v5145_v36 = vpop.eup %5144 }
 0xe53   :  { %v3617_v48 = vmul.f32 %v5145_v36, %v3566_v28 }
 0xe55   :  { %v3625_v50 = vadd.f32 %v4464_v53, %v3617_v48 }
 0xe57   :  { %v3627_v55 = vmin.f32 %v3625_v50, 0.0  ;;  %vm3626_vm12 = vcmp.gt.f32.partialorder %v3625_v50, 0.0 }
 0xe59   :  { %v3628_v57 = vmul.f32 1.442695, %v3627_v55 }
 0xe5b   :  { %5146 = vpow2.f32 %v3628_v57 }
 0xe65   :  { %v5147_v35 = vpop.eup %5146 }
 0xe66   :  { %v4465_v46 = vadd.f32 -1.0, %v5147_v35 }
 0xe68   :  { %v3631_v54 = vsel %vm3626_vm12, %v3625_v50, %v4465_v46 }
 0xe69   :  { %v3632_v4 = vpack.c.bf16 %v3631_v54, %v3631_v54 }
 0xe6b   :  { %4794 = vmatmul.mubr.bf16.vlgmr.msra.gmra.mrb[92].mxu0 %v3632_v4 }
 0xe6c   :  { %4799 = vmatprep.mubr.msk.bf16.mxu0 %vm224_vm2, %v5228_v21  ;;  %4798 = vmatpush3.bf16.msra.mxu0 %v3746_v52  ;;  %v4466_v21 = vld [vmem:[%s4212_s13] ss:$0 sm:$0xff] }
 0xe73   :  { %4800 = vmatmul.mubr.msk.bf16.vlgmr.msra.gmra.mrb[96].mxu0 %vm224_vm2, %v5230_v22 }
 0xe74   :  { %4811 = vmatprep.mubr.msk.bf16.mxu0 %vm294_vm4, %v5769_v11 }
 0xf3e   :  { %v3738_v63 = vpop.f32.mrb[92].mxu0 }
 0xf3f   :  { %v3739_v0 = vadd.f32 %v4466_v21, %v3738_v63  ;;  %v4795_v2 = vpop.f32.mrb[93].mxu0 }
 0xf40   :  { %v3741_v61 = vpop.f32.mrb[94].mxu0 }
 0xf41   :  { %v3796_v58 = vpack.c.bf16 %v3739_v0, %v3739_v0  ;;  %v4796_v9 = vpop.f32.mrb[95].mxu0 }
 0xf43   :  { %3849 = vrot.lane.b32.xlu1 %v3796_v58, %s5195_s14  ;;  %4904 = vmatprep.subr.msk.bf16.mxu1 %vm301_vm5, %v3796_v58  ;;  %v3798_v22 = vsel %vm301_vm5, %v3796_v58, 0 }
 0xf44   :  { %4804 = vmatpush3.bf16.msra.mxu1 %v3798_v22 }
 0xf47   :  { %4806 = vmatmul.mubr.msk.bf16.vlgmr.msra.gmra.mrb[72].mxu1 %vm294_vm4, %v5764_v10  ;;  %v3919_v10 = vld [vmem:[%s4214_s18] sm:$0x3] }
 0xf48   :  { %4906 = vmatprep.subr.msk.bf16.mxu1 %vm231_vm1, %v3919_v10  ;;  %v3927_v7 = vsel %vm231_vm1, %v3919_v10, 0 }
 0xf49   :  { %4816 = vmatpush3.bf16.msra.mxu1 %v3927_v7 }
 0xf4a   :  { %4829 = vmatprep.subr.bf16.mxu1 %v5175_v8 }
 0xfb5   :  { %v3850_v62 = vpop.permute.xlu1 %3849 }
 0xfb6   :  { %v3852_v5 = vsel %vm301_vm5, %v3850_v62, 0  ;;  %4905 = vmatprep.subr.msk.bf16.mxu0 %vm301_vm5, %v3850_v62 }
 0xfb7   :  { %4810 = vmatpush3.bf16.msra.mxu0 %v3852_v5 }
 0xfb8   :  { %4821 = vmatprep.subr.bf16.mxu0 %v5175_v8 }
 0xfba   :  { %4812 = vmatmul.mubr.msk.bf16.vlgmr.msra.gmra.mrb[96].mxu0 %vm294_vm4, %v5775_v42 }
 0xfbb   :  { %4825 = vmatprep.mubr.msk.bf16.mxu0 %vm5176_vm9, %v5175_v8 }
0x101a   :  { %v5871_v1 = vpop.f32.mrb[72].mxu1 }
0x101b   :  { %v5873_v3 = vpop.f32.mrb[73].mxu1 }
0x101c   :  { %v4808_v56 = vpop.f32.mrb[74].mxu1 }
0x101d   :  { %v5875_v27 = vpop.f32.mrb[75].mxu1 }
0x108d   :  { %v4813_v29 = vpop.f32.mrb[96].mxu0 }
0x108e   :  { %v3904_v37 = vadd.f32 %v4813_v29, %v5871_v1  ;;  %v3888_v12 = vpop.f32.mrb[97].mxu0 }
0x108f   :  { %v3902_v14 = vadd.f32 %v3888_v12, %v5873_v3  ;;  %v4814_v40 = vpop.f32.mrb[98].mxu0  ;;  %v4485_v12 = vld [vmem:[%s4215_s23] ss:$0 sm:$0xff] }
0x1090   :  { %v3913_v15 = vmul.f32 0.2, %v3904_v37  ;;  %v3891_v59 = vpop.f32.mrb[99].mxu0  ;;  %vm3910_vm1 = vcmp.gt.f32.partialorder %v3904_v37, 0.0 }
0x1091   :  { %v3911_v44 = vmul.f32 0.2, %v3902_v14  ;;  %v3903_v47 = vadd.f32 %v3891_v59, %v5875_v27  ;;  %vm3908_vm2 = vcmp.gt.f32.partialorder %v3902_v14, 0.0 }
0x1092   :  { %v3916_v16 = vsel %vm3910_vm1, %v3904_v37, %v3913_v15 }
0x1093   :  { %vm3909_vm13 = vcmp.gt.f32.partialorder %v3903_v47, 0.0  ;;  %v3912_v49 = vmul.f32 0.2, %v3903_v47  ;;  %v3914_v18 = vsel %vm3908_vm2, %v3902_v14, %v3911_v44  ;;  %v3918_v60 = vpack.c.bf16 %v3916_v16, %v3916_v16 }
0x1095   :  { %v3915_v20 = vsel %vm3909_vm13, %v3903_v47, %v3912_v49 }
0x1096   :  { %v3917_v23 = vpack.c.bf16 %v3915_v20, %v3914_v18 }
0x1098   :  { %4817 = vmatprep.mubr.msk.bf16.mxu1 %vm3401_vm11, %v3917_v23 }
0x1099   :  { %4818 = vmatmul.mubr.msk.bf16.vlgmr.msra.gmra.mrb[76].mxu1 %vm3401_vm11, %v3918_v60 }
0x109a   :  { %4833 = vmatprep.mubr.msk.bf16.mxu1 %vm5176_vm9, %v5175_v8 }
0x116c   :  { %v4819_v6 = vpop.f32.mrb[76].mxu1 }
0x116d   :  { %v3963_v13 = vpop.f32.mrb[77].mxu1  ;;  %v3980_v41 = vsel %vm3977_vm14, %v4819_v6, -inf }
0x116e   :  { %v4820_v38 = vpop.f32.mrb[78].mxu1  ;;  %v3978_v24 = vsel %vm3977_vm14, %v3963_v13, -inf }
0x116f   :  { %v3966_v17 = vpop.f32.mrb[79].mxu1 }
0x1170   :  { %v3979_v39 = vsel %vm3977_vm14, %v3966_v17, -inf }
0x1171   :  { %v3981_v25 = vmax.f32 %v3978_v24, %v3979_v39 }
0x1173   :  { %v3982_v26 = vmax.f32 %v3981_v25, %v3980_v41 }
0x1175   :  { %v3983_v28 = vrot.slane %v3982_v26, 4 }
0x1177   :  { %v3984_v30 = vmax.f32 %v3982_v26, %v3983_v28 }
0x1179   :  { %v3985_v31 = vrot.slane %v3984_v30, 2 }
0x117b   :  { %v3986_v45 = vmax.f32 %v3984_v30, %v3985_v31 }
0x117d   :  { %v3987_v19 = vrot.slane %v3986_v45, 1 }
0x117f   :  { %v3988_v32 = vmax.f32 %v3986_v45, %v3987_v19 }
0x1181   :  { %v3989_v33 = vsub.f32 %v3963_v13, %v3988_v32  ;;  %v3990_v34 = vsub.f32 %v3966_v17, %v3988_v32  ;;  %v3991_v36 = vsub.f32 %v4819_v6, %v3988_v32 }
0x1183   :  { %v3992_v53 = vmul.f32 1.442695, %v3989_v33  ;;  %v3994_v48 = vmul.f32 1.442695, %v3990_v34  ;;  %v3996_v50 = vmul.f32 1.442695, %v3991_v36 }
0x1185   :  { %5148 = vpow2.f32 %v3992_v53 }
0x1186   :  { %5150 = vpow2.f32 %v3994_v48 }
0x1187   :  { %5152 = vpow2.f32 %v3996_v50 }
0x118f   :  { %v5149_v55 = vpop.eup %5148 }
0x1190   :  { %v5887_v57 = vpop.eup %5150  ;;  %4045 = vperm.xlu1 %4943, %v5149_v55  }
0x1191   :  { %v5153_v35 = vpop.eup %5152  ;;  %4050 = vperm.xlu0 %4944, %v5887_v57   ;;  %v3998_v46 = vpack.c.bf16 %v5887_v57, %v5149_v55 }
0x1192   :  { %v3999_v54 = vpack.c.bf16 %v5153_v35, %v5153_v35 }
0x1193   :  { %4822 = vmatpush3.bf16.msra.mxu0 %v3998_v46 }
0x1194   :  { %4055 = vperm.xlu1 %4943, %v5153_v35   ;;  %4823 = vmatprep.subr.bf16.mxu0 %v5175_v8  ;;  %v4001_v4 = vsel %vm301_vm5, %v3999_v54, 0 }
0x1197   :  { %4824 = vmatpush3.bf16.msra.mxu0 %v4001_v4 }
0x119a   :  { %4826 = vmatmul.mubr.msk.bf16.vlgmr.msra.gmra.mrb[100].mxu0 %vm588_vm10, %v5308_v43 }
0x119b   :  { %4839 = vmatprep.mubr.msk.bf16.mxu0 %vm294_vm4, %v5769_v11 }
0x120f   :  { %v4046_v51 = vpop.permute.xlu1 %4045 }
0x1210   :  { %v4051_v52 = vpop.permute.xlu0 %4050  ;;  %v4058_v21 = vmul.f32 %v4046_v51, %v5873_v3 }
0x1211   :  { %v4059_v63 = vmul.f32 %v4051_v52, %v5875_v27 }
0x1213   :  { %v4061_v0 = vpack.c.bf16 %v4059_v63, %v4058_v21  ;;  %v4056_v2 = vpop.permute.xlu1 %4055 }
0x1214   :  { %v4060_v61 = vmul.f32 %v5871_v1, %v4056_v2 }
0x1215   :  { %4830 = vmatpush3.bf16.msra.mxu1 %v4061_v0 }
0x1216   :  { %v4062_v58 = vpack.c.bf16 %v4060_v61, %v4060_v61  ;;  %4831 = vmatprep.subr.bf16.mxu1 %v5175_v8 }
0x1218   :  { %v4064_v9 = vsel %vm301_vm5, %v4062_v58, 0 }
0x1219   :  { %4832 = vmatpush3.bf16.msra.mxu1 %v4064_v9 }
0x121c   :  { %4834 = vmatmul.mubr.msk.bf16.vlgmr.msra.gmra.mrb[80].mxu1 %vm588_vm10, %v5308_v43 }
0x126d   :  { %v4037_v11 = vpop.f32.mrb[100].mxu0 }
0x126e   :  { %v4038_v22 = vadd.f32 1e-16, %v4037_v11  ;;  %v4827_v62 = vpop.f32.mrb[101].mxu0 }
0x126f   :  { %v4040_v5 = vpop.f32.mrb[102].mxu0 }
0x1270   :  { %5154 = vrcp.f32 %v4038_v22  ;;  %4108 = vperm.xlu1 %4943, %v4038_v22   ;;  %v4828_v10 = vpop.f32.mrb[103].mxu0 }
0x127a   :  { %v5155_v7 = vpop.eup %5154 }
0x127b   :  { %v4124_v3 = vpack.c.bf16 %v5155_v7, %v5155_v7 }
0x127d   :  { %4907 = vmatprep.subr.msk.bf16.mxu0 %vm301_vm5, %v4124_v3  ;;  %v4126_v1 = vsel %vm301_vm5, %v4124_v3, 0 }
0x127e   :  { %4838 = vmatpush3.bf16.msra.mxu0 %v4126_v1 }
0x1281   :  { %4840 = vmatmul.mubr.msk.bf16.vlgmr.msra.gmra.mrb[104].mxu0 %vm294_vm4, %v5775_v42 }
0x12ef   :  { %v4109_v8 = vpop.permute.xlu1 %4108  ;;  %v4100_v56 = vpop.f32.mrb[80].mxu1 }
0x12f0   :  { %5156 = vrcp.f32 %v4109_v8  ;;  %v4835_v43 = vpop.f32.mrb[81].mxu1 }
0x12f1   :  { %v4103_v27 = vpop.f32.mrb[82].mxu1 }
0x12f2   :  { %v4836_v29 = vpop.f32.mrb[83].mxu1 }
0x12fa   :  { %v5157_v37 = vpop.eup %5156 }
0x12fb   :  { %v4112_v14 = vmul.f32 %v5157_v37, %v4100_v56 }
0x12fd   :  { %v4120_v42 = vadd.f32 %v4485_v12, %v4112_v14 }
0x12ff   :  { %4121 = vst.msk [vmem:[%s4216_s26] sm:$0xff] %vm3401_vm11, %v4120_v42 }
0x1354   :  { %v4841_v40 = vpop.f32.mrb[104].mxu0 }
0x1355   :  { %v4178_v15 = vmul.f32 %v5153_v35, %v4841_v40  ;;  %v4162_v59 = vpop.f32.mrb[105].mxu0 }
0x1356   :  { %v4176_v44 = vmul.f32 %v5149_v55, %v4162_v59  ;;  %v4842_v47 = vpop.f32.mrb[106].mxu0 }
0x1357   :  { %4181 = vst.msk [vmem:[%s4217_s30 + $0x10] sm:$0xff] %vm3977_vm14, %v4178_v15  ;;  %v4165_v49 = vpop.f32.mrb[107].mxu0 }
0x1358   :  { %4179 = vst.msk [vmem:[%s4217_s30] sm:$0xff] %vm3977_vm14, %v4176_v44  ;;  %v4177_v16 = vmul.f32 %v5887_v57, %v4165_v49 }
0x135a   :  { %4180 = vst.msk [vmem:[%s4217_s30 + $0x8] sm:$0xff] %vm3977_vm14, %v4177_v16 }

</bundles_post_ra>
